<compile_context>
chip_gen: v7x
topology: tpu7x:2x2x1
jax: 0.10.0
libtpu: 0.0.40
codegen_flags: <defaults>
</compile_context>

<pallas_src>
import numpy as np
import jax
import jax.numpy as jnp
from jax.experimental import pallas as pl
from jax.experimental.pallas import tpu as pltpu


# ------------------------------------------------------------------------- slab packer ---

class _Packer:
    """Packs 2-D f32 matrices into one (rows, width) slab at 8-aligned row offsets."""

    def __init__(self, width):
        self.width = width
        self.chunks = []
        self.nrows = 0

    def add(self, arr):
        a = np.asarray(arr, np.float32)
        if a.ndim == 1:
            a = a.reshape(1, -1)
        r, c = a.shape
        assert c <= self.width, (c, self.width)
        pad_r = (-r) % 8
        buf = np.zeros((r + pad_r, self.width), np.float32)
        buf[:r, :c] = a
        off = self.nrows
        self.chunks.append(buf)
        self.nrows += r + pad_r
        return off

    def finalize(self):
        if not self.chunks:
            return jnp.zeros((8, self.width), jnp.float32)
        return jnp.asarray(np.concatenate(self.chunks, axis=0))


# ------------------------------------------------------------------ fused Pallas kernel ---

def make_fused_astgcn(B, N, T, K, F_list, Fc, Ft, P, g, ofs, CW, TW):
    """forward(x_r, consts, thetas) -> (B, N, P); full ASTGCN stack in one pallas_call."""
    nb = len(F_list)
    BN = B * N
    TFt = T * Ft
    TFc = T * Fc

    def kernel(x_ref, c_ref, th_ref, out_ref):
        def dot(a, b):
            return jnp.dot(a, b, preferred_element_type=jnp.float32)

        def softmax0(s):  # torch F.softmax(dim=1) on a per-batch (M, M) slice
            s = s - jnp.max(s, axis=0, keepdims=True)
            e = jnp.exp(s)
            return e * pl.reciprocal(jnp.sum(e, axis=0, keepdims=True), approx=True)

        # globals (already VMEM resident; cheap vector loads, static offsets)
        cheb = [c_ref[g['cheb'] + k * N: g['cheb'] + (k + 1) * N, 0:N] for k in range(K)]
        meanmat = c_ref[g['meanmat']: g['meanmat'] + TFt, 0:TFt]   # kron(I_T, 1/Ft)
        wf = c_ref[g['wf']: g['wf'] + TFt, 0:P]                    # final head
        bf = c_ref[g['bf']: g['bf'] + 1, 0:P]

        # carried activations, both batches stacked: [b*N+n, t*F+f] = x[b, n, f, t]
        Xall = x_ref[...]                                          # (B*N, T*F0)

        for bi in range(nb):
            F = F_list[bi]
            TF = T * F
            o = ofs[bi]
            u1T   = c_ref[o['u1T']: o['u1T'] + B, 0:BN]            # (B, B*N) kron(I_B,U1^T)
            u2    = c_ref[o['u2']: o['u2'] + F, 0:N]               # (F, N)
            u3t   = c_ref[o['u3t']: o['u3t'] + TF, 0:T]            # (TF, T) kron(I_T,U3)
            ve    = c_ref[o['ve']: o['ve'] + T, 0:T]               # (T, T)
            be_   = c_ref[o['be']: o['be'] + T, 0:T]               # (T, T)
            w1row = c_ref[o['w1']: o['w1'] + 1, 0:T]               # (1, T)
            expF  = c_ref[o['expF']: o['expF'] + T, 0:TF]          # (T, TF) kron(I_T,1_F)
            gsumF = c_ref[o['gsumF']: o['gsumF'] + TF, 0:F]        # (TF, F) kron(1_T,I_F)
            w2    = c_ref[o['w2']: o['w2'] + F, 0:T]               # (F, T)
            w3t   = c_ref[o['w3t']: o['w3t'] + TF, 0:T]            # (TF, T) kron(I_T,W3)
            vs    = c_ref[o['vs']: o['vs'] + N, 0:N]               # (N, N)
            bs_   = c_ref[o['bs']: o['bs'] + N, 0:N]               # (N, N)
            wtb   = c_ref[o['wtband']: o['wtband'] + TFc, 0:TFt]   # banded (1,3) time conv
            wres  = c_ref[o['wres']: o['wres'] + TF, 0:TFt]        # kron(I_T, W_res^T)
            lnp   = c_ref[o['ln']: o['ln'] + 3, 0:TFt]             # bias / gamma / beta
            bias_t, gamma_t, beta_t = lnp[0:1, :], lnp[1:2, :], lnp[2:3, :]
            theta = th_ref[o['theta']: o['theta'] + TF, :]         # (TF, K*T*Fc)

            # ---- batched over both batches (shared weights, independent of E and S) ----
            rhs_all = dot(Xall, u3t)          # (B*N, T)   temporal-attn rhs
            xw3_all = dot(Xall, w3t)          # (B*N, T)   spatial-attn rhs (pre-E)
            a_rows  = dot(u1T, Xall)          # (B, TF)    sum_n U1[n] * x[b,n,f,t]
            xt_all  = dot(Xall, theta)        # (B*N, K*T*Fc)  all K Theta contractions

            sg_list = []
            for b in range(B):
                r0, r1 = b * N, (b + 1) * N
                Xb = Xall[r0:r1, :]                                  # (N, TF)

                # ---- temporal attention: E = softmax(Ve @ sigmoid(A@U2@rhs + be)) ----
                Cm = dot(u2, rhs_all[r0:r1, :])                      # (F, T)  U2 @ rhs
                Cbig = dot(gsumF, Cm)                                # (TF, T) tiled over t
                a_row = a_rows[b:b + 1, :]                           # (1, TF)
                e_pre = dot(ve, jax.nn.sigmoid(dot(expF * a_row, Cbig) + be_))
                E = softmax0(e_pre)                                  # (T, T)

                # ---- spatial attention on x_TAt = x @ E (never materialized) ----
                w1e = jnp.sum(E * w1row, axis=1, keepdims=True)      # (T, 1)  E @ W1
                w1exp = jnp.sum(expF * w1e, axis=0, keepdims=True)   # (1, TF)
                G = dot(Xb * w1exp, gsumF)                           # (N, F)
                lhs_s = dot(G, w2)                                   # (N, T)
                H = dot(xw3_all[r0:r1, :], E)                        # (N, T)
                s_pre = dot(vs, jax.nn.sigmoid(dot(lhs_s, H.T) + bs_))
                S = softmax0(s_pre)                                  # (N, N)

                # ---- Chebyshev graph conv (Theta already folded into xt_all) ----
                xt_b = xt_all[r0:r1, :]
                sg = dot((cheb[0] * S).T, xt_b[:, 0:TFc])
                for k in range(1, K):
                    sg = sg + dot((cheb[k] * S).T, xt_b[:, k * TFc:(k + 1) * TFc])
                sg_list.append(sg)

            sg_all = jnp.maximum(jnp.concatenate(sg_list, axis=0), 0.0)   # (B*N, T*Fc)

            # ---- (1,3) time conv + (1,1) residual + ReLU + LayerNorm(Ft), batched ----
            y = dot(sg_all, wtb) + dot(Xall, wres) + bias_t          # (B*N, T*Ft)
            y = jnp.maximum(y, 0.0)
            mu = dot(y, meanmat)                                     # per-(n,t) mean
            ysq = dot(y * y, meanmat)                                # per-(n,t) E[y^2]
            var = jnp.maximum(ysq - mu * mu, 0.0)
            Xall = (y - mu) * jax.lax.rsqrt(var + 1e-5) * gamma_t + beta_t

        # ---- final conv head: single matmul + single store for both batches ----
        out_ref[...] = dot(Xall, wf) + bf                            # (B*N, P)

    vmem = pl.BlockSpec(memory_space=pltpu.MemorySpace.VMEM)

    @jax.jit
    def forward(x_r, consts, thetas):
        out = pl.pallas_call(
            kernel,
            out_shape=jax.ShapeDtypeStruct((BN, P), jnp.float32),
            in_specs=[vmem, vmem, vmem],
            out_specs=vmem,
        )(x_r, consts, thetas)
        return out.reshape(B, N, P)

    return forward


# -------------------------------------------------------- one-time parameter preparation ---

def prepare_inputs(x, block_params, cheb, W_final, b_final):
    """Pack input + all weights into 2 constant slabs in the layouts the kernel consumes."""
    B, N, F0, T = x.shape
    K = int(cheb.shape[0])
    Fc = int(block_params[0]['Theta'].shape[2])
    Ft = int(block_params[0]['W_time'].shape[0])
    P = int(W_final.shape[0])
    F_list = tuple(int(p['U2'].shape[0]) for p in block_params)

    eyeT = np.eye(T, dtype=np.float32)
    CW = max(T * Ft, T * max(F_list), B * N, N, T, P)   # consts slab lane width
    TW = K * T * Fc                                     # theta slab lane width

    cpk = _Packer(CW)
    tpk = _Packer(TW)

    g = dict(
        cheb=cpk.add(np.asarray(cheb, np.float32).reshape(K * N, N)),
        meanmat=cpk.add(np.kron(eyeT, np.full((Ft, Ft), 1.0 / Ft, np.float32))),
        wf=cpk.add(np.asarray(W_final, np.float32).transpose(1, 2, 0).reshape(T * Ft, P)),
        bf=cpk.add(np.asarray(b_final, np.float32).reshape(1, P)),
    )

    ofs = []
    for p in block_params:
        F = int(p['U2'].shape[0])
        eyeF = np.eye(F, dtype=np.float32)
        u1row = np.asarray(p['U1'], np.float32).reshape(1, N)
        # banded matrix of the (1,3) temporal conv (cross-correlation, padding=(0,1))
        Wt = np.asarray(p['W_time'], np.float32)                       # (Ft, Fc, 3)
        band = np.zeros((T * Fc, T * Ft), np.float32)
        for t in range(T):
            for j in range(3):
                ts = t + j - 1
                if 0 <= ts < T:
                    band[ts * Fc:(ts + 1) * Fc, t * Ft:(t + 1) * Ft] = Wt[:, :, j].T
        ln = np.stack([
            np.tile(np.asarray(p['b_time'] + p['b_res'], np.float32).reshape(Ft), T),
            np.tile(np.asarray(p['gamma'], np.float32).reshape(Ft), T),
            np.tile(np.asarray(p['beta'], np.float32).reshape(Ft), T)], axis=0)
        theta_cat = np.concatenate(
            [np.kron(eyeT, np.asarray(p['Theta'][k], np.float32)) for k in range(K)], axis=1)

        ofs.append(dict(
            u1T=cpk.add(np.kron(np.eye(B, dtype=np.float32), u1row)),          # (B, B*N)
            u2=cpk.add(np.asarray(p['U2'], np.float32)),                       # (F, N)
            u3t=cpk.add(np.kron(eyeT, np.asarray(p['U3'], np.float32).reshape(F, 1))),
            ve=cpk.add(np.asarray(p['Ve'], np.float32)),
            be=cpk.add(np.asarray(p['be'], np.float32)),
            w1=cpk.add(np.asarray(p['W1'], np.float32).reshape(1, T)),
            expF=cpk.add(np.kron(eyeT, np.ones((1, F), np.float32))),          # (T, T*F)
            gsumF=cpk.add(np.kron(np.ones((T, 1), np.float32), eyeF)),         # (T*F, F)
            w2=cpk.add(np.asarray(p['W2'], np.float32)),
            w3t=cpk.add(np.kron(eyeT, np.asarray(p['W3'], np.float32).reshape(F, 1))),
            vs=cpk.add(np.asarray(p['Vs'], np.float32)),
            bs=cpk.add(np.asarray(p['bs'], np.float32)),
            wtband=cpk.add(band),                                              # (T*Fc, T*Ft)
            wres=cpk.add(np.kron(eyeT, np.asarray(p['W_res'], np.float32).T)), # (T*F, T*Ft)
            ln=cpk.add(ln),                                                    # (3, T*Ft)
            theta=tpk.add(theta_cat),                                          # (T*F, K*T*Fc)
        ))

    consts = cpk.finalize()
    thetas = tpk.finalize()
    # (B, N, F, T) -> (B*N, T*F) with [b*N+n, t*F+f] = x[b, n, f, t]
    x_r = jnp.asarray(x, jnp.float32).transpose(0, 1, 3, 2).reshape(B * N, T * F0)
    meta = dict(B=B, N=N, T=T, K=K, F_list=F_list, Fc=Fc, Ft=Ft, P=P,
                g=g, ofs=ofs, CW=CW, TW=TW)
    return x_r, consts, thetas, meta


# -------------------------------------------------------------- pure-JAX reference model ---

def astgcn_reference(x, block_params, cheb, W_final, b_final):
    def softmax0(m):  # softmax over dim=1 of (B, M, M)
        m = m - m.max(axis=1, keepdims=True)
        e = jnp.exp(m)
        return e / e.sum(axis=1, keepdims=True)

    h = x
    for p in block_params:
        B, N, F, T = h.shape
        Fc = p['Theta'].shape[2]
        Ft = p['W_time'].shape[0]
        # temporal attention
        lhs = jnp.einsum('bnft,n,fm->btm', h, p['U1'], p['U2'])
        rhs = jnp.einsum('f,bnft->bnt', p['U3'], h)
        E = jnp.matmul(p['Ve'], jax.nn.sigmoid(jnp.matmul(lhs, rhs) + p['be']))
        E = softmax0(E)
        x_TAt = jnp.matmul(h.reshape(B, N * F, T), E).reshape(B, N, F, T)
        # spatial attention
        lhs_s = jnp.einsum('bnft,t,fm->bnm', x_TAt, p['W1'], p['W2'])
        rhs_s = jnp.einsum('f,bnft->bnt', p['W3'], x_TAt)
        S = jnp.matmul(p['Vs'], jax.nn.sigmoid(
            jnp.matmul(lhs_s, rhs_s.transpose(0, 2, 1)) + p['bs']))
        S = softmax0(S)
        # Chebyshev graph conv with spatial attention
        out = jnp.zeros((B, N, Fc, T), jnp.float32)
        for k in range(cheb.shape[0]):
            TkS = cheb[k][None] * S
            rhs_g = jnp.einsum('bnm,bnft->bmft', TkS, h)
            out = out + jnp.einsum('bmft,fc->bmct', rhs_g, p['Theta'][k])
        sg = jax.nn.relu(out)
        # (1,3) time conv + (1,1) residual + ReLU + LayerNorm(Ft)
        sg_pad = jnp.pad(sg, ((0, 0), (0, 0), (0, 0), (1, 1)))
        tc = jnp.zeros((B, N, Ft, T), jnp.float32)
        for j in range(3):
            tc = tc + jnp.einsum('bnct,fc->bnft', sg_pad[..., j:j + T], p['W_time'][:, :, j])
        tc = tc + p['b_time'].reshape(1, 1, Ft, 1)
        res = jnp.einsum('bnft,gf->bngt', h, p['W_res']) + p['b_res'].reshape(1, 1, Ft, 1)
        y = jax.nn.relu(tc + res)
        mu = y.mean(axis=2, keepdims=True)
        var = ((y - mu) ** 2).mean(axis=2, keepdims=True)
        h = ((y - mu) / jnp.sqrt(var + 1e-5)) * p['gamma'].reshape(1, 1, Ft, 1) \
            + p['beta'].reshape(1, 1, Ft, 1)
    return jnp.einsum('bnft,ptf->bnp', h, W_final) + b_final.reshape(1, 1, -1)


# ------------------------------------------------------------------------ parameter init ---

def cheb_polynomials_np(A, K):
    N = A.shape[0]
    D = np.diag(A.sum(axis=1))
    L = D - A
    lam_max = float(np.linalg.eigvalsh(L).max())
    L_t = (2.0 * L) / lam_max - np.eye(N)
    polys = [np.eye(N), L_t.copy()]
    for _ in range(2, K):
        polys.append(2.0 * L_t @ polys[-1] - polys[-2])
    return np.stack(polys[:K]).astype(np.float32)


def init_block_params(key, F_in, N, T, K, F_chev, F_time, scale=0.1):
    ks = jax.random.split(key, 13)
    return dict(
        U1=jax.random.normal(ks[0], (N,), jnp.float32) * scale,
        U2=jax.random.normal(ks[1], (F_in, N), jnp.float32) * scale,
        U3=jax.random.normal(ks[2], (F_in,), jnp.float32) * scale,
        be=jax.random.normal(ks[3], (T, T), jnp.float32) * scale,
        Ve=jax.random.normal(ks[4], (T, T), jnp.float32) * scale,
        W1=jax.random.normal(ks[5], (T,), jnp.float32) * scale,
        W2=jax.random.normal(ks[6], (F_in, T), jnp.float32) * scale,
        W3=jax.random.normal(ks[7], (F_in,), jnp.float32) * scale,
        bs=jax.random.normal(ks[8], (N, N), jnp.float32) * scale,
        Vs=jax.random.normal(ks[9], (N, N), jnp.float32) * scale,
        Theta=jax.random.normal(ks[10], (K, F_in, F_chev), jnp.float32) * scale,
        W_time=jax.random.normal(ks[11], (F_time, F_chev, 3), jnp.float32) * scale,
        b_time=jnp.zeros((F_time,), jnp.float32),
        W_res=jax.random.normal(ks[12], (F_time, F_in), jnp.float32) * scale,
        b_res=jnp.zeros((F_time,), jnp.float32),
        gamma=jnp.ones((F_time,), jnp.float32),
        beta=jnp.zeros((F_time,), jnp.float32),
    )


# ----------------------------------------------------------------------------------- main ---

if __name__ == "__main__":
    # ASTGCN config: IN_CHANNELS=4, K=3, NB_CHEV_FILTER=NB_TIME_FILTER=8,
    # LEN_INPUT=8, NUM_FOR_PREDICT=4, NODES=8, NB_BLOCK=2, TIME_STRIDES=1
    B, N, F_in, T = 2, 8, 4, 8
    K, F_chev, F_time = 3, 8, 8
    num_for_predict, nb_block = 4, 2
    # TODO(synk): time_strides > 1 (strided temporal conv) not implemented; TIME_STRIDES=1 assumed.

    key = jax.random.PRNGKey(0)
    kx, kp = jax.random.split(key)
    x = jax.random.normal(kx, (B, N, F_in, T), jnp.float32)

    # Deterministic ring adjacency stands in for get_adjacency_matrix(csv) (no file I/O).
    A = np.zeros((N, N), np.float32)
    for i in range(N):
        A[i, (i + 1) % N] = 1.0
        A[(i + 1) % N, i] = 1.0
    cheb = jnp.asarray(cheb_polynomials_np(A, K))

    keys = jax.random.split(kp, nb_block + 1)
    block_params = []
    f_in_b = F_in
    for b in range(nb_block):
        block_params.append(init_block_params(keys[b], f_in_b, N, T, K, F_chev, F_time))
        f_in_b = F_time
    W_final = jax.random.normal(keys[-1], (num_for_predict, T, F_time), jnp.float32) * 0.1
    b_final = jnp.zeros((num_for_predict,), jnp.float32)

    x_r, consts, thetas, meta = prepare_inputs(x, block_params, cheb, W_final, b_final)
    forward = make_fused_astgcn(**meta)

    out = jax.block_until_ready(forward(x_r, consts, thetas))
    assert out.shape == (B, N, num_for_predict)
    assert bool(jnp.all(jnp.isfinite(out)))

    # numerical check against a pure-JAX reference of the original torch math
    ref = jax.block_until_ready(astgcn_reference(x, block_params, cheb, W_final, b_final))
    np.testing.assert_allclose(np.asarray(out), np.asarray(ref), rtol=2e-2, atol=5e-3)

    print("KERNEL_OK")
</pallas_src>

<mosaic_0001>
module attributes {stable_mosaic.version = 11 : i64} {
  func.func @kernel(%arg0: memref<16x32xf32, #tpu.memory_space<vmem>>, %arg1: memref<832x64xf32, #tpu.memory_space<vmem>>, %arg2: memref<96x192xf32, #tpu.memory_space<vmem>>, %arg3: memref<16x4xf32, #tpu.memory_space<vmem>>) attributes {dimension_semantics = [], scalar_prefetch = 0 : i64, scratch_operands = 0 : i64, tpu.core_type = #tpu.core_type<tc>} {
    %c0 = arith.constant 0 : index
    %c0_0 = arith.constant 0 : index
    %0 = vector.load %arg1[%c0, %c0_0] : memref<832x64xf32, #tpu.memory_space<vmem>>, vector<8x8xf32>
    %c8 = arith.constant 8 : index
    %c0_1 = arith.constant 0 : index
    %1 = vector.load %arg1[%c8, %c0_1] : memref<832x64xf32, #tpu.memory_space<vmem>>, vector<8x8xf32>
    %c16 = arith.constant 16 : index
    %c0_2 = arith.constant 0 : index
    %2 = vector.load %arg1[%c16, %c0_2] : memref<832x64xf32, #tpu.memory_space<vmem>>, vector<8x8xf32>
    %c24 = arith.constant 24 : index
    %c0_3 = arith.constant 0 : index
    %3 = vector.load %arg1[%c24, %c0_3] : memref<832x64xf32, #tpu.memory_space<vmem>>, vector<64x64xf32>
    %c88 = arith.constant 88 : index
    %c0_4 = arith.constant 0 : index
    %4 = vector.load %arg1[%c88, %c0_4] : memref<832x64xf32, #tpu.memory_space<vmem>>, vector<64x4xf32>
    %c152 = arith.constant 152 : index
    %c0_5 = arith.constant 0 : index
    %5 = vector.load %arg1[%c152, %c0_5] : memref<832x64xf32, #tpu.memory_space<vmem>>, vector<1x4xf32>
    %c0_6 = arith.constant 0 : index
    %c0_7 = arith.constant 0 : index
    %6 = vector.load %arg0[%c0_6, %c0_7] : memref<16x32xf32, #tpu.memory_space<vmem>>, vector<16x32xf32>
    %c160 = arith.constant 160 : index
    %c0_8 = arith.constant 0 : index
    %7 = vector.load %arg1[%c160, %c0_8] : memref<832x64xf32, #tpu.memory_space<vmem>>, vector<2x16xf32>
    %c168 = arith.constant 168 : index
    %c0_9 = arith.constant 0 : index
    %8 = vector.load %arg1[%c168, %c0_9] : memref<832x64xf32, #tpu.memory_space<vmem>>, vector<4x8xf32>
    %c176 = arith.constant 176 : index
    %c0_10 = arith.constant 0 : index
    %9 = vector.load %arg1[%c176, %c0_10] : memref<832x64xf32, #tpu.memory_space<vmem>>, vector<32x8xf32>
    %c208 = arith.constant 208 : index
    %c0_11 = arith.constant 0 : index
    %10 = vector.load %arg1[%c208, %c0_11] : memref<832x64xf32, #tpu.memory_space<vmem>>, vector<8x8xf32>
    %c216 = arith.constant 216 : index
    %c0_12 = arith.constant 0 : index
    %11 = vector.load %arg1[%c216, %c0_12] : memref<832x64xf32, #tpu.memory_space<vmem>>, vector<8x8xf32>
    %c224 = arith.constant 224 : index
    %c0_13 = arith.constant 0 : index
    %12 = vector.load %arg1[%c224, %c0_13] : memref<832x64xf32, #tpu.memory_space<vmem>>, vector<1x8xf32>
    %c232 = arith.constant 232 : index
    %c0_14 = arith.constant 0 : index
    %13 = vector.load %arg1[%c232, %c0_14] : memref<832x64xf32, #tpu.memory_space<vmem>>, vector<8x32xf32>
    %c240 = arith.constant 240 : index
    %c0_15 = arith.constant 0 : index
    %14 = vector.load %arg1[%c240, %c0_15] : memref<832x64xf32, #tpu.memory_space<vmem>>, vector<32x4xf32>
    %c272 = arith.constant 272 : index
    %c0_16 = arith.constant 0 : index
    %15 = vector.load %arg1[%c272, %c0_16] : memref<832x64xf32, #tpu.memory_space<vmem>>, vector<4x8xf32>
    %c280 = arith.constant 280 : index
    %c0_17 = arith.constant 0 : index
    %16 = vector.load %arg1[%c280, %c0_17] : memref<832x64xf32, #tpu.memory_space<vmem>>, vector<32x8xf32>
    %c312 = arith.constant 312 : index
    %c0_18 = arith.constant 0 : index
    %17 = vector.load %arg1[%c312, %c0_18] : memref<832x64xf32, #tpu.memory_space<vmem>>, vector<8x8xf32>
    %c320 = arith.constant 320 : index
    %c0_19 = arith.constant 0 : index
    %18 = vector.load %arg1[%c320, %c0_19] : memref<832x64xf32, #tpu.memory_space<vmem>>, vector<8x8xf32>
    %c328 = arith.constant 328 : index
    %c0_20 = arith.constant 0 : index
    %19 = vector.load %arg1[%c328, %c0_20] : memref<832x64xf32, #tpu.memory_space<vmem>>, vector<64x64xf32>
    %c392 = arith.constant 392 : index
    %c0_21 = arith.constant 0 : index
    %20 = vector.load %arg1[%c392, %c0_21] : memref<832x64xf32, #tpu.memory_space<vmem>>, vector<32x64xf32>
    %c424 = arith.constant 424 : index
    %c0_22 = arith.constant 0 : index
    %21 = vector.load %arg1[%c424, %c0_22] : memref<832x64xf32, #tpu.memory_space<vmem>>, vector<3x64xf32>
    %22 = vector.extract_strided_slice %21 {offsets = [0, 0], sizes = [1, 64], strides = [1, 1]} : vector<3x64xf32> to vector<1x64xf32>
    %23 = vector.extract_strided_slice %21 {offsets = [1, 0], sizes = [1, 64], strides = [1, 1]} : vector<3x64xf32> to vector<1x64xf32>
    %24 = vector.extract_strided_slice %21 {offsets = [2, 0], sizes = [1, 64], strides = [1, 1]} : vector<3x64xf32> to vector<1x64xf32>
    %c0_23 = arith.constant 0 : index
    %c0_24 = arith.constant 0 : index
    %25 = vector.load %arg2[%c0_23, %c0_24] : memref<96x192xf32, #tpu.memory_space<vmem>>, vector<32x192xf32>
    %cst = arith.constant dense<0.000000e+00> : vector<16x8xf32>
    %26 = tpu.matmul %6, %9, %cst {dimension_numbers = #tpu.dot_dimension_numbers<[1], [0], [0], [1], [0, 0, 1, 1], [], []>} : vector<16x32xf32>, vector<32x8xf32>, vector<16x8xf32> -> vector<16x8xf32>
    %cst_25 = arith.constant dense<0.000000e+00> : vector<16x8xf32>
    %27 = tpu.matmul %6, %16, %cst_25 {dimension_numbers = #tpu.dot_dimension_numbers<[1], [0], [0], [1], [0, 0, 1, 1], [], []>} : vector<16x32xf32>, vector<32x8xf32>, vector<16x8xf32> -> vector<16x8xf32>
    %cst_26 = arith.constant dense<0.000000e+00> : vector<2x32xf32>
    %28 = tpu.matmul %7, %6, %cst_26 {dimension_numbers = #tpu.dot_dimension_numbers<[1], [0], [0], [1], [0, 0, 1, 1], [], []>} : vector<2x16xf32>, vector<16x32xf32>, vector<2x32xf32> -> vector<2x32xf32>
    %cst_27 = arith.constant dense<0.000000e+00> : vector<16x192xf32>
    %29 = tpu.matmul %6, %25, %cst_27 {dimension_numbers = #tpu.dot_dimension_numbers<[1], [0], [0], [1], [0, 0, 1, 1], [], []>} : vector<16x32xf32>, vector<32x192xf32>, vector<16x192xf32> -> vector<16x192xf32>
    %30 = vector.extract_strided_slice %6 {offsets = [0, 0], sizes = [8, 32], strides = [1, 1]} : vector<16x32xf32> to vector<8x32xf32>
    %31 = vector.extract_strided_slice %26 {offsets = [0, 0], sizes = [8, 8], strides = [1, 1]} : vector<16x8xf32> to vector<8x8xf32>
    %cst_28 = arith.constant dense<0.000000e+00> : vector<4x8xf32>
    %32 = tpu.matmul %8, %31, %cst_28 {dimension_numbers = #tpu.dot_dimension_numbers<[1], [0], [0], [1], [0, 0, 1, 1], [], []>} : vector<4x8xf32>, vector<8x8xf32>, vector<4x8xf32> -> vector<4x8xf32>
    %cst_29 = arith.constant dense<0.000000e+00> : vector<32x8xf32>
    %33 = tpu.matmul %14, %32, %cst_29 {dimension_numbers = #tpu.dot_dimension_numbers<[1], [0], [0], [1], [0, 0, 1, 1], [], []>} : vector<32x4xf32>, vector<4x8xf32>, vector<32x8xf32> -> vector<32x8xf32>
    %34 = vector.extract_strided_slice %28 {offsets = [0, 0], sizes = [1, 32], strides = [1, 1]} : vector<2x32xf32> to vector<1x32xf32>
    %35 = vector.broadcast %34 : vector<1x32xf32> to vector<8x32xf32>
    %36 = arith.mulf %13, %35 : vector<8x32xf32>
    %cst_30 = arith.constant dense<0.000000e+00> : vector<8x8xf32>
    %37 = tpu.matmul %36, %33, %cst_30 {dimension_numbers = #tpu.dot_dimension_numbers<[1], [0], [0], [1], [0, 0, 1, 1], [], []>} : vector<8x32xf32>, vector<32x8xf32>, vector<8x8xf32> -> vector<8x8xf32>
    %38 = arith.addf %37, %11 : vector<8x8xf32>
    %39 = arith.negf %38 : vector<8x8xf32>
    %40 = math.exp %39 : vector<8x8xf32>
    %cst_31 = arith.constant 1.000000e+00 : f32
    %41 = vector.broadcast %cst_31 : f32 to vector<8x8xf32>
    %42 = arith.addf %41, %40 : vector<8x8xf32>
    %43 = arith.divf %41, %42 : vector<8x8xf32>
    %cst_32 = arith.constant dense<0.000000e+00> : vector<8x8xf32>
    %44 = tpu.matmul %10, %43, %cst_32 {dimension_numbers = #tpu.dot_dimension_numbers<[1], [0], [0], [1], [0, 0, 1, 1], [], []>} : vector<8x8xf32>, vector<8x8xf32>, vector<8x8xf32> -> vector<8x8xf32>
    %cst_33 = arith.constant dense<0xFF800000> : vector<8xf32>
    %45 = vector.multi_reduction <maximumf>, %44, %cst_33 [0] : vector<8x8xf32> to vector<8xf32>
    %46 = vector.shape_cast %45 : vector<8xf32> to vector<1x8xf32>
    %47 = vector.broadcast %46 : vector<1x8xf32> to vector<8x8xf32>
    %48 = arith.subf %44, %47 : vector<8x8xf32>
    %49 = math.exp %48 : vector<8x8xf32>
    %cst_34 = arith.constant dense<0.000000e+00> : vector<8xf32>
    %50 = vector.multi_reduction <add>, %49, %cst_34 [0] : vector<8x8xf32> to vector<8xf32>
    %51 = vector.shape_cast %50 : vector<8xf32> to vector<1x8xf32>
    %52 = tpu.reciprocal %51 {approx = true} : vector<1x8xf32> -> vector<1x8xf32>
    %53 = vector.broadcast %52 : vector<1x8xf32> to vector<8x8xf32>
    %54 = arith.mulf %49, %53 : vector<8x8xf32>
    %55 = vector.broadcast %12 : vector<1x8xf32> to vector<8x8xf32>
    %56 = arith.mulf %54, %55 : vector<8x8xf32>
    %cst_35 = arith.constant dense<0.000000e+00> : vector<8xf32>
    %57 = vector.multi_reduction <add>, %56, %cst_35 [1] : vector<8x8xf32> to vector<8xf32>
    %58 = vector.shape_cast %57 : vector<8xf32> to vector<8x1xf32>
    %59 = vector.broadcast %58 : vector<8x1xf32> to vector<8x32xf32>
    %60 = arith.mulf %13, %59 : vector<8x32xf32>
    %cst_36 = arith.constant dense<0.000000e+00> : vector<32xf32>
    %61 = vector.multi_reduction <add>, %60, %cst_36 [0] : vector<8x32xf32> to vector<32xf32>
    %62 = vector.shape_cast %61 : vector<32xf32> to vector<1x32xf32>
    %63 = vector.broadcast %62 : vector<1x32xf32> to vector<8x32xf32>
    %64 = arith.mulf %30, %63 : vector<8x32xf32>
    %cst_37 = arith.constant dense<0.000000e+00> : vector<8x4xf32>
    %65 = tpu.matmul %64, %14, %cst_37 {dimension_numbers = #tpu.dot_dimension_numbers<[1], [0], [0], [1], [0, 0, 1, 1], [], []>} : vector<8x32xf32>, vector<32x4xf32>, vector<8x4xf32> -> vector<8x4xf32>
    %cst_38 = arith.constant dense<0.000000e+00> : vector<8x8xf32>
    %66 = tpu.matmul %65, %15, %cst_38 {dimension_numbers = #tpu.dot_dimension_numbers<[1], [0], [0], [1], [0, 0, 1, 1], [], []>} : vector<8x4xf32>, vector<4x8xf32>, vector<8x8xf32> -> vector<8x8xf32>
    %67 = vector.extract_strided_slice %27 {offsets = [0, 0], sizes = [8, 8], strides = [1, 1]} : vector<16x8xf32> to vector<8x8xf32>
    %cst_39 = arith.constant dense<0.000000e+00> : vector<8x8xf32>
    %68 = tpu.matmul %67, %54, %cst_39 {dimension_numbers = #tpu.dot_dimension_numbers<[1], [0], [0], [1], [0, 0, 1, 1], [], []>} : vector<8x8xf32>, vector<8x8xf32>, vector<8x8xf32> -> vector<8x8xf32>
    %69 = tpu.transpose %68, [1, 0] : vector<8x8xf32> -> vector<8x8xf32>
    %cst_40 = arith.constant dense<0.000000e+00> : vector<8x8xf32>
    %70 = tpu.matmul %66, %69, %cst_40 {dimension_numbers = #tpu.dot_dimension_numbers<[1], [0], [0], [1], [0, 0, 1, 1], [], []>} : vector<8x8xf32>, vector<8x8xf32>, vector<8x8xf32> -> vector<8x8xf32>
    %71 = arith.addf %70, %18 : vector<8x8xf32>
    %72 = arith.negf %71 : vector<8x8xf32>
    %73 = math.exp %72 : vector<8x8xf32>
    %cst_41 = arith.constant 1.000000e+00 : f32
    %74 = vector.broadcast %cst_41 : f32 to vector<8x8xf32>
    %75 = arith.addf %74, %73 : vector<8x8xf32>
    %76 = arith.divf %74, %75 : vector<8x8xf32>
    %cst_42 = arith.constant dense<0.000000e+00> : vector<8x8xf32>
    %77 = tpu.matmul %17, %76, %cst_42 {dimension_numbers = #tpu.dot_dimension_numbers<[1], [0], [0], [1], [0, 0, 1, 1], [], []>} : vector<8x8xf32>, vector<8x8xf32>, vector<8x8xf32> -> vector<8x8xf32>
    %cst_43 = arith.constant dense<0xFF800000> : vector<8xf32>
    %78 = vector.multi_reduction <maximumf>, %77, %cst_43 [0] : vector<8x8xf32> to vector<8xf32>
    %79 = vector.shape_cast %78 : vector<8xf32> to vector<1x8xf32>
    %80 = vector.broadcast %79 : vector<1x8xf32> to vector<8x8xf32>
    %81 = arith.subf %77, %80 : vector<8x8xf32>
    %82 = math.exp %81 : vector<8x8xf32>
    %cst_44 = arith.constant dense<0.000000e+00> : vector<8xf32>
    %83 = vector.multi_reduction <add>, %82, %cst_44 [0] : vector<8x8xf32> to vector<8xf32>
    %84 = vector.shape_cast %83 : vector<8xf32> to vector<1x8xf32>
    %85 = tpu.reciprocal %84 {approx = true} : vector<1x8xf32> -> vector<1x8xf32>
    %86 = vector.broadcast %85 : vector<1x8xf32> to vector<8x8xf32>
    %87 = arith.mulf %82, %86 : vector<8x8xf32>
    %88 = vector.extract_strided_slice %29 {offsets = [0, 0], sizes = [8, 192], strides = [1, 1]} : vector<16x192xf32> to vector<8x192xf32>
    %89 = arith.mulf %0, %87 : vector<8x8xf32>
    %90 = tpu.transpose %89, [1, 0] : vector<8x8xf32> -> vector<8x8xf32>
    %91 = vector.extract_strided_slice %88 {offsets = [0, 0], sizes = [8, 64], strides = [1, 1]} : vector<8x192xf32> to vector<8x64xf32>
    %cst_45 = arith.constant dense<0.000000e+00> : vector<8x64xf32>
    %92 = tpu.matmul %90, %91, %cst_45 {dimension_numbers = #tpu.dot_dimension_numbers<[1], [0], [0], [1], [0, 0, 1, 1], [], []>} : vector<8x8xf32>, vector<8x64xf32>, vector<8x64xf32> -> vector<8x64xf32>
    %93 = arith.mulf %1, %87 : vector<8x8xf32>
    %94 = tpu.transpose %93, [1, 0] : vector<8x8xf32> -> vector<8x8xf32>
    %95 = vector.extract_strided_slice %88 {offsets = [0, 64], sizes = [8, 64], strides = [1, 1]} : vector<8x192xf32> to vector<8x64xf32>
    %cst_46 = arith.constant dense<0.000000e+00> : vector<8x64xf32>
    %96 = tpu.matmul %94, %95, %cst_46 {dimension_numbers = #tpu.dot_dimension_numbers<[1], [0], [0], [1], [0, 0, 1, 1], [], []>} : vector<8x8xf32>, vector<8x64xf32>, vector<8x64xf32> -> vector<8x64xf32>
    %97 = arith.addf %92, %96 : vector<8x64xf32>
    %98 = arith.mulf %2, %87 : vector<8x8xf32>
    %99 = tpu.transpose %98, [1, 0] : vector<8x8xf32> -> vector<8x8xf32>
    %100 = vector.extract_strided_slice %88 {offsets = [0, 128], sizes = [8, 64], strides = [1, 1]} : vector<8x192xf32> to vector<8x64xf32>
    %cst_47 = arith.constant dense<0.000000e+00> : vector<8x64xf32>
    %101 = tpu.matmul %99, %100, %cst_47 {dimension_numbers = #tpu.dot_dimension_numbers<[1], [0], [0], [1], [0, 0, 1, 1], [], []>} : vector<8x8xf32>, vector<8x64xf32>, vector<8x64xf32> -> vector<8x64xf32>
    %102 = arith.addf %97, %101 : vector<8x64xf32>
    %103 = vector.extract_strided_slice %6 {offsets = [8, 0], sizes = [8, 32], strides = [1, 1]} : vector<16x32xf32> to vector<8x32xf32>
    %104 = vector.extract_strided_slice %26 {offsets = [8, 0], sizes = [8, 8], strides = [1, 1]} : vector<16x8xf32> to vector<8x8xf32>
    %cst_48 = arith.constant dense<0.000000e+00> : vector<4x8xf32>
    %105 = tpu.matmul %8, %104, %cst_48 {dimension_numbers = #tpu.dot_dimension_numbers<[1], [0], [0], [1], [0, 0, 1, 1], [], []>} : vector<4x8xf32>, vector<8x8xf32>, vector<4x8xf32> -> vector<4x8xf32>
    %cst_49 = arith.constant dense<0.000000e+00> : vector<32x8xf32>
    %106 = tpu.matmul %14, %105, %cst_49 {dimension_numbers = #tpu.dot_dimension_numbers<[1], [0], [0], [1], [0, 0, 1, 1], [], []>} : vector<32x4xf32>, vector<4x8xf32>, vector<32x8xf32> -> vector<32x8xf32>
    %107 = vector.extract_strided_slice %28 {offsets = [1, 0], sizes = [1, 32], strides = [1, 1]} : vector<2x32xf32> to vector<1x32xf32>
    %108 = vector.broadcast %107 : vector<1x32xf32> to vector<8x32xf32>
    %109 = arith.mulf %13, %108 : vector<8x32xf32>
    %cst_50 = arith.constant dense<0.000000e+00> : vector<8x8xf32>
    %110 = tpu.matmul %109, %106, %cst_50 {dimension_numbers = #tpu.dot_dimension_numbers<[1], [0], [0], [1], [0, 0, 1, 1], [], []>} : vector<8x32xf32>, vector<32x8xf32>, vector<8x8xf32> -> vector<8x8xf32>
    %111 = arith.addf %110, %11 : vector<8x8xf32>
    %112 = arith.negf %111 : vector<8x8xf32>
    %113 = math.exp %112 : vector<8x8xf32>
    %cst_51 = arith.constant 1.000000e+00 : f32
    %114 = vector.broadcast %cst_51 : f32 to vector<8x8xf32>
    %115 = arith.addf %114, %113 : vector<8x8xf32>
    %116 = arith.divf %114, %115 : vector<8x8xf32>
    %cst_52 = arith.constant dense<0.000000e+00> : vector<8x8xf32>
    %117 = tpu.matmul %10, %116, %cst_52 {dimension_numbers = #tpu.dot_dimension_numbers<[1], [0], [0], [1], [0, 0, 1, 1], [], []>} : vector<8x8xf32>, vector<8x8xf32>, vector<8x8xf32> -> vector<8x8xf32>
    %cst_53 = arith.constant dense<0xFF800000> : vector<8xf32>
    %118 = vector.multi_reduction <maximumf>, %117, %cst_53 [0] : vector<8x8xf32> to vector<8xf32>
    %119 = vector.shape_cast %118 : vector<8xf32> to vector<1x8xf32>
    %120 = vector.broadcast %119 : vector<1x8xf32> to vector<8x8xf32>
    %121 = arith.subf %117, %120 : vector<8x8xf32>
    %122 = math.exp %121 : vector<8x8xf32>
    %cst_54 = arith.constant dense<0.000000e+00> : vector<8xf32>
    %123 = vector.multi_reduction <add>, %122, %cst_54 [0] : vector<8x8xf32> to vector<8xf32>
    %124 = vector.shape_cast %123 : vector<8xf32> to vector<1x8xf32>
    %125 = tpu.reciprocal %124 {approx = true} : vector<1x8xf32> -> vector<1x8xf32>
    %126 = vector.broadcast %125 : vector<1x8xf32> to vector<8x8xf32>
    %127 = arith.mulf %122, %126 : vector<8x8xf32>
    %128 = vector.broadcast %12 : vector<1x8xf32> to vector<8x8xf32>
    %129 = arith.mulf %127, %128 : vector<8x8xf32>
    %cst_55 = arith.constant dense<0.000000e+00> : vector<8xf32>
    %130 = vector.multi_reduction <add>, %129, %cst_55 [1] : vector<8x8xf32> to vector<8xf32>
    %131 = vector.shape_cast %130 : vector<8xf32> to vector<8x1xf32>
    %132 = vector.broadcast %131 : vector<8x1xf32> to vector<8x32xf32>
    %133 = arith.mulf %13, %132 : vector<8x32xf32>
    %cst_56 = arith.constant dense<0.000000e+00> : vector<32xf32>
    %134 = vector.multi_reduction <add>, %133, %cst_56 [0] : vector<8x32xf32> to vector<32xf32>
    %135 = vector.shape_cast %134 : vector<32xf32> to vector<1x32xf32>
    %136 = vector.broadcast %135 : vector<1x32xf32> to vector<8x32xf32>
    %137 = arith.mulf %103, %136 : vector<8x32xf32>
    %cst_57 = arith.constant dense<0.000000e+00> : vector<8x4xf32>
    %138 = tpu.matmul %137, %14, %cst_57 {dimension_numbers = #tpu.dot_dimension_numbers<[1], [0], [0], [1], [0, 0, 1, 1], [], []>} : vector<8x32xf32>, vector<32x4xf32>, vector<8x4xf32> -> vector<8x4xf32>
    %cst_58 = arith.constant dense<0.000000e+00> : vector<8x8xf32>
    %139 = tpu.matmul %138, %15, %cst_58 {dimension_numbers = #tpu.dot_dimension_numbers<[1], [0], [0], [1], [0, 0, 1, 1], [], []>} : vector<8x4xf32>, vector<4x8xf32>, vector<8x8xf32> -> vector<8x8xf32>
    %140 = vector.extract_strided_slice %27 {offsets = [8, 0], sizes = [8, 8], strides = [1, 1]} : vector<16x8xf32> to vector<8x8xf32>
    %cst_59 = arith.constant dense<0.000000e+00> : vector<8x8xf32>
    %141 = tpu.matmul %140, %127, %cst_59 {dimension_numbers = #tpu.dot_dimension_numbers<[1], [0], [0], [1], [0, 0, 1, 1], [], []>} : vector<8x8xf32>, vector<8x8xf32>, vector<8x8xf32> -> vector<8x8xf32>
    %142 = tpu.transpose %141, [1, 0] : vector<8x8xf32> -> vector<8x8xf32>
    %cst_60 = arith.constant dense<0.000000e+00> : vector<8x8xf32>
    %143 = tpu.matmul %139, %142, %cst_60 {dimension_numbers = #tpu.dot_dimension_numbers<[1], [0], [0], [1], [0, 0, 1, 1], [], []>} : vector<8x8xf32>, vector<8x8xf32>, vector<8x8xf32> -> vector<8x8xf32>
    %144 = arith.addf %143, %18 : vector<8x8xf32>
    %145 = arith.negf %144 : vector<8x8xf32>
    %146 = math.exp %145 : vector<8x8xf32>
    %cst_61 = arith.constant 1.000000e+00 : f32
    %147 = vector.broadcast %cst_61 : f32 to vector<8x8xf32>
    %148 = arith.addf %147, %146 : vector<8x8xf32>
    %149 = arith.divf %147, %148 : vector<8x8xf32>
    %cst_62 = arith.constant dense<0.000000e+00> : vector<8x8xf32>
    %150 = tpu.matmul %17, %149, %cst_62 {dimension_numbers = #tpu.dot_dimension_numbers<[1], [0], [0], [1], [0, 0, 1, 1], [], []>} : vector<8x8xf32>, vector<8x8xf32>, vector<8x8xf32> -> vector<8x8xf32>
    %cst_63 = arith.constant dense<0xFF800000> : vector<8xf32>
    %151 = vector.multi_reduction <maximumf>, %150, %cst_63 [0] : vector<8x8xf32> to vector<8xf32>
    %152 = vector.shape_cast %151 : vector<8xf32> to vector<1x8xf32>
    %153 = vector.broadcast %152 : vector<1x8xf32> to vector<8x8xf32>
    %154 = arith.subf %150, %153 : vector<8x8xf32>
    %155 = math.exp %154 : vector<8x8xf32>
    %cst_64 = arith.constant dense<0.000000e+00> : vector<8xf32>
    %156 = vector.multi_reduction <add>, %155, %cst_64 [0] : vector<8x8xf32> to vector<8xf32>
    %157 = vector.shape_cast %156 : vector<8xf32> to vector<1x8xf32>
    %158 = tpu.reciprocal %157 {approx = true} : vector<1x8xf32> -> vector<1x8xf32>
    %159 = vector.broadcast %158 : vector<1x8xf32> to vector<8x8xf32>
    %160 = arith.mulf %155, %159 : vector<8x8xf32>
    %161 = vector.extract_strided_slice %29 {offsets = [8, 0], sizes = [8, 192], strides = [1, 1]} : vector<16x192xf32> to vector<8x192xf32>
    %162 = arith.mulf %0, %160 : vector<8x8xf32>
    %163 = tpu.transpose %162, [1, 0] : vector<8x8xf32> -> vector<8x8xf32>
    %164 = vector.extract_strided_slice %161 {offsets = [0, 0], sizes = [8, 64], strides = [1, 1]} : vector<8x192xf32> to vector<8x64xf32>
    %cst_65 = arith.constant dense<0.000000e+00> : vector<8x64xf32>
    %165 = tpu.matmul %163, %164, %cst_65 {dimension_numbers = #tpu.dot_dimension_numbers<[1], [0], [0], [1], [0, 0, 1, 1], [], []>} : vector<8x8xf32>, vector<8x64xf32>, vector<8x64xf32> -> vector<8x64xf32>
    %166 = arith.mulf %1, %160 : vector<8x8xf32>
    %167 = tpu.transpose %166, [1, 0] : vector<8x8xf32> -> vector<8x8xf32>
    %168 = vector.extract_strided_slice %161 {offsets = [0, 64], sizes = [8, 64], strides = [1, 1]} : vector<8x192xf32> to vector<8x64xf32>
    %cst_66 = arith.constant dense<0.000000e+00> : vector<8x64xf32>
    %169 = tpu.matmul %167, %168, %cst_66 {dimension_numbers = #tpu.dot_dimension_numbers<[1], [0], [0], [1], [0, 0, 1, 1], [], []>} : vector<8x8xf32>, vector<8x64xf32>, vector<8x64xf32> -> vector<8x64xf32>
    %170 = arith.addf %165, %169 : vector<8x64xf32>
    %171 = arith.mulf %2, %160 : vector<8x8xf32>
    %172 = tpu.transpose %171, [1, 0] : vector<8x8xf32> -> vector<8x8xf32>
    %173 = vector.extract_strided_slice %161 {offsets = [0, 128], sizes = [8, 64], strides = [1, 1]} : vector<8x192xf32> to vector<8x64xf32>
    %cst_67 = arith.constant dense<0.000000e+00> : vector<8x64xf32>
    %174 = tpu.matmul %172, %173, %cst_67 {dimension_numbers = #tpu.dot_dimension_numbers<[1], [0], [0], [1], [0, 0, 1, 1], [], []>} : vector<8x8xf32>, vector<8x64xf32>, vector<8x64xf32> -> vector<8x64xf32>
    %175 = arith.addf %170, %174 : vector<8x64xf32>
    %176 = tpu.concatenate %102, %175 in 0 : vector<8x64xf32>, vector<8x64xf32> -> vector<16x64xf32>
    %cst_68 = arith.constant 0.000000e+00 : f32
    %177 = vector.broadcast %cst_68 : f32 to vector<16x64xf32>
    %178 = arith.maximumf %176, %177 : vector<16x64xf32>
    %cst_69 = arith.constant dense<0.000000e+00> : vector<16x64xf32>
    %179 = tpu.matmul %178, %19, %cst_69 {dimension_numbers = #tpu.dot_dimension_numbers<[1], [0], [0], [1], [0, 0, 1, 1], [], []>} : vector<16x64xf32>, vector<64x64xf32>, vector<16x64xf32> -> vector<16x64xf32>
    %cst_70 = arith.constant dense<0.000000e+00> : vector<16x64xf32>
    %180 = tpu.matmul %6, %20, %cst_70 {dimension_numbers = #tpu.dot_dimension_numbers<[1], [0], [0], [1], [0, 0, 1, 1], [], []>} : vector<16x32xf32>, vector<32x64xf32>, vector<16x64xf32> -> vector<16x64xf32>
    %181 = arith.addf %179, %180 : vector<16x64xf32>
    %182 = vector.broadcast %22 : vector<1x64xf32> to vector<16x64xf32>
    %183 = arith.addf %181, %182 : vector<16x64xf32>
    %cst_71 = arith.constant 0.000000e+00 : f32
    %184 = vector.broadcast %cst_71 : f32 to vector<16x64xf32>
    %185 = arith.maximumf %183, %184 : vector<16x64xf32>
    %cst_72 = arith.constant dense<0.000000e+00> : vector<16x64xf32>
    %186 = tpu.matmul %185, %3, %cst_72 {dimension_numbers = #tpu.dot_dimension_numbers<[1], [0], [0], [1], [0, 0, 1, 1], [], []>} : vector<16x64xf32>, vector<64x64xf32>, vector<16x64xf32> -> vector<16x64xf32>
    %187 = arith.mulf %185, %185 : vector<16x64xf32>
    %cst_73 = arith.constant dense<0.000000e+00> : vector<16x64xf32>
    %188 = tpu.matmul %187, %3, %cst_73 {dimension_numbers = #tpu.dot_dimension_numbers<[1], [0], [0], [1], [0, 0, 1, 1], [], []>} : vector<16x64xf32>, vector<64x64xf32>, vector<16x64xf32> -> vector<16x64xf32>
    %189 = arith.mulf %186, %186 : vector<16x64xf32>
    %190 = arith.subf %188, %189 : vector<16x64xf32>
    %cst_74 = arith.constant 0.000000e+00 : f32
    %191 = vector.broadcast %cst_74 : f32 to vector<16x64xf32>
    %192 = arith.maximumf %190, %191 : vector<16x64xf32>
    %193 = arith.subf %185, %186 : vector<16x64xf32>
    %cst_75 = arith.constant 9.99999974E-6 : f32
    %194 = vector.broadcast %cst_75 : f32 to vector<16x64xf32>
    %195 = arith.addf %192, %194 : vector<16x64xf32>
    %196 = math.rsqrt %195 : vector<16x64xf32>
    %197 = arith.mulf %193, %196 : vector<16x64xf32>
    %198 = vector.broadcast %23 : vector<1x64xf32> to vector<16x64xf32>
    %199 = arith.mulf %197, %198 : vector<16x64xf32>
    %200 = vector.broadcast %24 : vector<1x64xf32> to vector<16x64xf32>
    %201 = arith.addf %199, %200 : vector<16x64xf32>
    %c432 = arith.constant 432 : index
    %c0_76 = arith.constant 0 : index
    %202 = vector.load %arg1[%c432, %c0_76] : memref<832x64xf32, #tpu.memory_space<vmem>>, vector<2x16xf32>
    %c440 = arith.constant 440 : index
    %c0_77 = arith.constant 0 : index
    %203 = vector.load %arg1[%c440, %c0_77] : memref<832x64xf32, #tpu.memory_space<vmem>>, vector<8x8xf32>
    %c448 = arith.constant 448 : index
    %c0_78 = arith.constant 0 : index
    %204 = vector.load %arg1[%c448, %c0_78] : memref<832x64xf32, #tpu.memory_space<vmem>>, vector<64x8xf32>
    %c512 = arith.constant 512 : index
    %c0_79 = arith.constant 0 : index
    %205 = vector.load %arg1[%c512, %c0_79] : memref<832x64xf32, #tpu.memory_space<vmem>>, vector<8x8xf32>
    %c520 = arith.constant 520 : index
    %c0_80 = arith.constant 0 : index
    %206 = vector.load %arg1[%c520, %c0_80] : memref<832x64xf32, #tpu.memory_space<vmem>>, vector<8x8xf32>
    %c528 = arith.constant 528 : index
    %c0_81 = arith.constant 0 : index
    %207 = vector.load %arg1[%c528, %c0_81] : memref<832x64xf32, #tpu.memory_space<vmem>>, vector<1x8xf32>
    %c536 = arith.constant 536 : index
    %c0_82 = arith.constant 0 : index
    %208 = vector.load %arg1[%c536, %c0_82] : memref<832x64xf32, #tpu.memory_space<vmem>>, vector<8x64xf32>
    %c544 = arith.constant 544 : index
    %c0_83 = arith.constant 0 : index
    %209 = vector.load %arg1[%c544, %c0_83] : memref<832x64xf32, #tpu.memory_space<vmem>>, vector<64x8xf32>
    %c608 = arith.constant 608 : index
    %c0_84 = arith.constant 0 : index
    %210 = vector.load %arg1[%c608, %c0_84] : memref<832x64xf32, #tpu.memory_space<vmem>>, vector<8x8xf32>
    %c616 = arith.constant 616 : index
    %c0_85 = arith.constant 0 : index
    %211 = vector.load %arg1[%c616, %c0_85] : memref<832x64xf32, #tpu.memory_space<vmem>>, vector<64x8xf32>
    %c680 = arith.constant 680 : index
    %c0_86 = arith.constant 0 : index
    %212 = vector.load %arg1[%c680, %c0_86] : memref<832x64xf32, #tpu.memory_space<vmem>>, vector<8x8xf32>
    %c688 = arith.constant 688 : index
    %c0_87 = arith.constant 0 : index
    %213 = vector.load %arg1[%c688, %c0_87] : memref<832x64xf32, #tpu.memory_space<vmem>>, vector<8x8xf32>
    %c696 = arith.constant 696 : index
    %c0_88 = arith.constant 0 : index
    %214 = vector.load %arg1[%c696, %c0_88] : memref<832x64xf32, #tpu.memory_space<vmem>>, vector<64x64xf32>
    %c760 = arith.constant 760 : index
    %c0_89 = arith.constant 0 : index
    %215 = vector.load %arg1[%c760, %c0_89] : memref<832x64xf32, #tpu.memory_space<vmem>>, vector<64x64xf32>
    %c824 = arith.constant 824 : index
    %c0_90 = arith.constant 0 : index
    %216 = vector.load %arg1[%c824, %c0_90] : memref<832x64xf32, #tpu.memory_space<vmem>>, vector<3x64xf32>
    %217 = vector.extract_strided_slice %216 {offsets = [0, 0], sizes = [1, 64], strides = [1, 1]} : vector<3x64xf32> to vector<1x64xf32>
    %218 = vector.extract_strided_slice %216 {offsets = [1, 0], sizes = [1, 64], strides = [1, 1]} : vector<3x64xf32> to vector<1x64xf32>
    %219 = vector.extract_strided_slice %216 {offsets = [2, 0], sizes = [1, 64], strides = [1, 1]} : vector<3x64xf32> to vector<1x64xf32>
    %c32 = arith.constant 32 : index
    %c0_91 = arith.constant 0 : index
    %220 = vector.load %arg2[%c32, %c0_91] : memref<96x192xf32, #tpu.memory_space<vmem>>, vector<64x192xf32>
    %cst_92 = arith.constant dense<0.000000e+00> : vector<16x8xf32>
    %221 = tpu.matmul %201, %204, %cst_92 {dimension_numbers = #tpu.dot_dimension_numbers<[1], [0], [0], [1], [0, 0, 1, 1], [], []>} : vector<16x64xf32>, vector<64x8xf32>, vector<16x8xf32> -> vector<16x8xf32>
    %cst_93 = arith.constant dense<0.000000e+00> : vector<16x8xf32>
    %222 = tpu.matmul %201, %211, %cst_93 {dimension_numbers = #tpu.dot_dimension_numbers<[1], [0], [0], [1], [0, 0, 1, 1], [], []>} : vector<16x64xf32>, vector<64x8xf32>, vector<16x8xf32> -> vector<16x8xf32>
    %cst_94 = arith.constant dense<0.000000e+00> : vector<2x64xf32>
    %223 = tpu.matmul %202, %201, %cst_94 {dimension_numbers = #tpu.dot_dimension_numbers<[1], [0], [0], [1], [0, 0, 1, 1], [], []>} : vector<2x16xf32>, vector<16x64xf32>, vector<2x64xf32> -> vector<2x64xf32>
    %cst_95 = arith.constant dense<0.000000e+00> : vector<16x192xf32>
    %224 = tpu.matmul %201, %220, %cst_95 {dimension_numbers = #tpu.dot_dimension_numbers<[1], [0], [0], [1], [0, 0, 1, 1], [], []>} : vector<16x64xf32>, vector<64x192xf32>, vector<16x192xf32> -> vector<16x192xf32>
    %225 = vector.extract_strided_slice %201 {offsets = [0, 0], sizes = [8, 64], strides = [1, 1]} : vector<16x64xf32> to vector<8x64xf32>
    %226 = vector.extract_strided_slice %221 {offsets = [0, 0], sizes = [8, 8], strides = [1, 1]} : vector<16x8xf32> to vector<8x8xf32>
    %cst_96 = arith.constant dense<0.000000e+00> : vector<8x8xf32>
    %227 = tpu.matmul %203, %226, %cst_96 {dimension_numbers = #tpu.dot_dimension_numbers<[1], [0], [0], [1], [0, 0, 1, 1], [], []>} : vector<8x8xf32>, vector<8x8xf32>, vector<8x8xf32> -> vector<8x8xf32>
    %cst_97 = arith.constant dense<0.000000e+00> : vector<64x8xf32>
    %228 = tpu.matmul %209, %227, %cst_97 {dimension_numbers = #tpu.dot_dimension_numbers<[1], [0], [0], [1], [0, 0, 1, 1], [], []>} : vector<64x8xf32>, vector<8x8xf32>, vector<64x8xf32> -> vector<64x8xf32>
    %229 = vector.extract_strided_slice %223 {offsets = [0, 0], sizes = [1, 64], strides = [1, 1]} : vector<2x64xf32> to vector<1x64xf32>
    %230 = vector.broadcast %229 : vector<1x64xf32> to vector<8x64xf32>
    %231 = arith.mulf %208, %230 : vector<8x64xf32>
    %cst_98 = arith.constant dense<0.000000e+00> : vector<8x8xf32>
    %232 = tpu.matmul %231, %228, %cst_98 {dimension_numbers = #tpu.dot_dimension_numbers<[1], [0], [0], [1], [0, 0, 1, 1], [], []>} : vector<8x64xf32>, vector<64x8xf32>, vector<8x8xf32> -> vector<8x8xf32>
    %233 = arith.addf %232, %206 : vector<8x8xf32>
    %234 = arith.negf %233 : vector<8x8xf32>
    %235 = math.exp %234 : vector<8x8xf32>
    %cst_99 = arith.constant 1.000000e+00 : f32
    %236 = vector.broadcast %cst_99 : f32 to vector<8x8xf32>
    %237 = arith.addf %236, %235 : vector<8x8xf32>
    %238 = arith.divf %236, %237 : vector<8x8xf32>
    %cst_100 = arith.constant dense<0.000000e+00> : vector<8x8xf32>
    %239 = tpu.matmul %205, %238, %cst_100 {dimension_numbers = #tpu.dot_dimension_numbers<[1], [0], [0], [1], [0, 0, 1, 1], [], []>} : vector<8x8xf32>, vector<8x8xf32>, vector<8x8xf32> -> vector<8x8xf32>
    %cst_101 = arith.constant dense<0xFF800000> : vector<8xf32>
    %240 = vector.multi_reduction <maximumf>, %239, %cst_101 [0] : vector<8x8xf32> to vector<8xf32>
    %241 = vector.shape_cast %240 : vector<8xf32> to vector<1x8xf32>
    %242 = vector.broadcast %241 : vector<1x8xf32> to vector<8x8xf32>
    %243 = arith.subf %239, %242 : vector<8x8xf32>
    %244 = math.exp %243 : vector<8x8xf32>
    %cst_102 = arith.constant dense<0.000000e+00> : vector<8xf32>
    %245 = vector.multi_reduction <add>, %244, %cst_102 [0] : vector<8x8xf32> to vector<8xf32>
    %246 = vector.shape_cast %245 : vector<8xf32> to vector<1x8xf32>
    %247 = tpu.reciprocal %246 {approx = true} : vector<1x8xf32> -> vector<1x8xf32>
    %248 = vector.broadcast %247 : vector<1x8xf32> to vector<8x8xf32>
    %249 = arith.mulf %244, %248 : vector<8x8xf32>
    %250 = vector.broadcast %207 : vector<1x8xf32> to vector<8x8xf32>
    %251 = arith.mulf %249, %250 : vector<8x8xf32>
    %cst_103 = arith.constant dense<0.000000e+00> : vector<8xf32>
    %252 = vector.multi_reduction <add>, %251, %cst_103 [1] : vector<8x8xf32> to vector<8xf32>
    %253 = vector.shape_cast %252 : vector<8xf32> to vector<8x1xf32>
    %254 = vector.broadcast %253 : vector<8x1xf32> to vector<8x64xf32>
    %255 = arith.mulf %208, %254 : vector<8x64xf32>
    %cst_104 = arith.constant dense<0.000000e+00> : vector<64xf32>
    %256 = vector.multi_reduction <add>, %255, %cst_104 [0] : vector<8x64xf32> to vector<64xf32>
    %257 = vector.shape_cast %256 : vector<64xf32> to vector<1x64xf32>
    %258 = vector.broadcast %257 : vector<1x64xf32> to vector<8x64xf32>
    %259 = arith.mulf %225, %258 : vector<8x64xf32>
    %cst_105 = arith.constant dense<0.000000e+00> : vector<8x8xf32>
    %260 = tpu.matmul %259, %209, %cst_105 {dimension_numbers = #tpu.dot_dimension_numbers<[1], [0], [0], [1], [0, 0, 1, 1], [], []>} : vector<8x64xf32>, vector<64x8xf32>, vector<8x8xf32> -> vector<8x8xf32>
    %cst_106 = arith.constant dense<0.000000e+00> : vector<8x8xf32>
    %261 = tpu.matmul %260, %210, %cst_106 {dimension_numbers = #tpu.dot_dimension_numbers<[1], [0], [0], [1], [0, 0, 1, 1], [], []>} : vector<8x8xf32>, vector<8x8xf32>, vector<8x8xf32> -> vector<8x8xf32>
    %262 = vector.extract_strided_slice %222 {offsets = [0, 0], sizes = [8, 8], strides = [1, 1]} : vector<16x8xf32> to vector<8x8xf32>
    %cst_107 = arith.constant dense<0.000000e+00> : vector<8x8xf32>
    %263 = tpu.matmul %262, %249, %cst_107 {dimension_numbers = #tpu.dot_dimension_numbers<[1], [0], [0], [1], [0, 0, 1, 1], [], []>} : vector<8x8xf32>, vector<8x8xf32>, vector<8x8xf32> -> vector<8x8xf32>
    %264 = tpu.transpose %263, [1, 0] : vector<8x8xf32> -> vector<8x8xf32>
    %cst_108 = arith.constant dense<0.000000e+00> : vector<8x8xf32>
    %265 = tpu.matmul %261, %264, %cst_108 {dimension_numbers = #tpu.dot_dimension_numbers<[1], [0], [0], [1], [0, 0, 1, 1], [], []>} : vector<8x8xf32>, vector<8x8xf32>, vector<8x8xf32> -> vector<8x8xf32>
    %266 = arith.addf %265, %213 : vector<8x8xf32>
    %267 = arith.negf %266 : vector<8x8xf32>
    %268 = math.exp %267 : vector<8x8xf32>
    %cst_109 = arith.constant 1.000000e+00 : f32
    %269 = vector.broadcast %cst_109 : f32 to vector<8x8xf32>
    %270 = arith.addf %269, %268 : vector<8x8xf32>
    %271 = arith.divf %269, %270 : vector<8x8xf32>
    %cst_110 = arith.constant dense<0.000000e+00> : vector<8x8xf32>
    %272 = tpu.matmul %212, %271, %cst_110 {dimension_numbers = #tpu.dot_dimension_numbers<[1], [0], [0], [1], [0, 0, 1, 1], [], []>} : vector<8x8xf32>, vector<8x8xf32>, vector<8x8xf32> -> vector<8x8xf32>
    %cst_111 = arith.constant dense<0xFF800000> : vector<8xf32>
    %273 = vector.multi_reduction <maximumf>, %272, %cst_111 [0] : vector<8x8xf32> to vector<8xf32>
    %274 = vector.shape_cast %273 : vector<8xf32> to vector<1x8xf32>
    %275 = vector.broadcast %274 : vector<1x8xf32> to vector<8x8xf32>
    %276 = arith.subf %272, %275 : vector<8x8xf32>
    %277 = math.exp %276 : vector<8x8xf32>
    %cst_112 = arith.constant dense<0.000000e+00> : vector<8xf32>
    %278 = vector.multi_reduction <add>, %277, %cst_112 [0] : vector<8x8xf32> to vector<8xf32>
    %279 = vector.shape_cast %278 : vector<8xf32> to vector<1x8xf32>
    %280 = tpu.reciprocal %279 {approx = true} : vector<1x8xf32> -> vector<1x8xf32>
    %281 = vector.broadcast %280 : vector<1x8xf32> to vector<8x8xf32>
    %282 = arith.mulf %277, %281 : vector<8x8xf32>
    %283 = vector.extract_strided_slice %224 {offsets = [0, 0], sizes = [8, 192], strides = [1, 1]} : vector<16x192xf32> to vector<8x192xf32>
    %284 = arith.mulf %0, %282 : vector<8x8xf32>
    %285 = tpu.transpose %284, [1, 0] : vector<8x8xf32> -> vector<8x8xf32>
    %286 = vector.extract_strided_slice %283 {offsets = [0, 0], sizes = [8, 64], strides = [1, 1]} : vector<8x192xf32> to vector<8x64xf32>
    %cst_113 = arith.constant dense<0.000000e+00> : vector<8x64xf32>
    %287 = tpu.matmul %285, %286, %cst_113 {dimension_numbers = #tpu.dot_dimension_numbers<[1], [0], [0], [1], [0, 0, 1, 1], [], []>} : vector<8x8xf32>, vector<8x64xf32>, vector<8x64xf32> -> vector<8x64xf32>
    %288 = arith.mulf %1, %282 : vector<8x8xf32>
    %289 = tpu.transpose %288, [1, 0] : vector<8x8xf32> -> vector<8x8xf32>
    %290 = vector.extract_strided_slice %283 {offsets = [0, 64], sizes = [8, 64], strides = [1, 1]} : vector<8x192xf32> to vector<8x64xf32>
    %cst_114 = arith.constant dense<0.000000e+00> : vector<8x64xf32>
    %291 = tpu.matmul %289, %290, %cst_114 {dimension_numbers = #tpu.dot_dimension_numbers<[1], [0], [0], [1], [0, 0, 1, 1], [], []>} : vector<8x8xf32>, vector<8x64xf32>, vector<8x64xf32> -> vector<8x64xf32>
    %292 = arith.addf %287, %291 : vector<8x64xf32>
    %293 = arith.mulf %2, %282 : vector<8x8xf32>
    %294 = tpu.transpose %293, [1, 0] : vector<8x8xf32> -> vector<8x8xf32>
    %295 = vector.extract_strided_slice %283 {offsets = [0, 128], sizes = [8, 64], strides = [1, 1]} : vector<8x192xf32> to vector<8x64xf32>
    %cst_115 = arith.constant dense<0.000000e+00> : vector<8x64xf32>
    %296 = tpu.matmul %294, %295, %cst_115 {dimension_numbers = #tpu.dot_dimension_numbers<[1], [0], [0], [1], [0, 0, 1, 1], [], []>} : vector<8x8xf32>, vector<8x64xf32>, vector<8x64xf32> -> vector<8x64xf32>
    %297 = arith.addf %292, %296 : vector<8x64xf32>
    %298 = vector.extract_strided_slice %201 {offsets = [8, 0], sizes = [8, 64], strides = [1, 1]} : vector<16x64xf32> to vector<8x64xf32>
    %299 = vector.extract_strided_slice %221 {offsets = [8, 0], sizes = [8, 8], strides = [1, 1]} : vector<16x8xf32> to vector<8x8xf32>
    %cst_116 = arith.constant dense<0.000000e+00> : vector<8x8xf32>
    %300 = tpu.matmul %203, %299, %cst_116 {dimension_numbers = #tpu.dot_dimension_numbers<[1], [0], [0], [1], [0, 0, 1, 1], [], []>} : vector<8x8xf32>, vector<8x8xf32>, vector<8x8xf32> -> vector<8x8xf32>
    %cst_117 = arith.constant dense<0.000000e+00> : vector<64x8xf32>
    %301 = tpu.matmul %209, %300, %cst_117 {dimension_numbers = #tpu.dot_dimension_numbers<[1], [0], [0], [1], [0, 0, 1, 1], [], []>} : vector<64x8xf32>, vector<8x8xf32>, vector<64x8xf32> -> vector<64x8xf32>
    %302 = vector.extract_strided_slice %223 {offsets = [1, 0], sizes = [1, 64], strides = [1, 1]} : vector<2x64xf32> to vector<1x64xf32>
    %303 = vector.broadcast %302 : vector<1x64xf32> to vector<8x64xf32>
    %304 = arith.mulf %208, %303 : vector<8x64xf32>
    %cst_118 = arith.constant dense<0.000000e+00> : vector<8x8xf32>
    %305 = tpu.matmul %304, %301, %cst_118 {dimension_numbers = #tpu.dot_dimension_numbers<[1], [0], [0], [1], [0, 0, 1, 1], [], []>} : vector<8x64xf32>, vector<64x8xf32>, vector<8x8xf32> -> vector<8x8xf32>
    %306 = arith.addf %305, %206 : vector<8x8xf32>
    %307 = arith.negf %306 : vector<8x8xf32>
    %308 = math.exp %307 : vector<8x8xf32>
    %cst_119 = arith.constant 1.000000e+00 : f32
    %309 = vector.broadcast %cst_119 : f32 to vector<8x8xf32>
    %310 = arith.addf %309, %308 : vector<8x8xf32>
    %311 = arith.divf %309, %310 : vector<8x8xf32>
    %cst_120 = arith.constant dense<0.000000e+00> : vector<8x8xf32>
    %312 = tpu.matmul %205, %311, %cst_120 {dimension_numbers = #tpu.dot_dimension_numbers<[1], [0], [0], [1], [0, 0, 1, 1], [], []>} : vector<8x8xf32>, vector<8x8xf32>, vector<8x8xf32> -> vector<8x8xf32>
    %cst_121 = arith.constant dense<0xFF800000> : vector<8xf32>
    %313 = vector.multi_reduction <maximumf>, %312, %cst_121 [0] : vector<8x8xf32> to vector<8xf32>
    %314 = vector.shape_cast %313 : vector<8xf32> to vector<1x8xf32>
    %315 = vector.broadcast %314 : vector<1x8xf32> to vector<8x8xf32>
    %316 = arith.subf %312, %315 : vector<8x8xf32>
    %317 = math.exp %316 : vector<8x8xf32>
    %cst_122 = arith.constant dense<0.000000e+00> : vector<8xf32>
    %318 = vector.multi_reduction <add>, %317, %cst_122 [0] : vector<8x8xf32> to vector<8xf32>
    %319 = vector.shape_cast %318 : vector<8xf32> to vector<1x8xf32>
    %320 = tpu.reciprocal %319 {approx = true} : vector<1x8xf32> -> vector<1x8xf32>
    %321 = vector.broadcast %320 : vector<1x8xf32> to vector<8x8xf32>
    %322 = arith.mulf %317, %321 : vector<8x8xf32>
    %323 = vector.broadcast %207 : vector<1x8xf32> to vector<8x8xf32>
    %324 = arith.mulf %322, %323 : vector<8x8xf32>
    %cst_123 = arith.constant dense<0.000000e+00> : vector<8xf32>
    %325 = vector.multi_reduction <add>, %324, %cst_123 [1] : vector<8x8xf32> to vector<8xf32>
    %326 = vector.shape_cast %325 : vector<8xf32> to vector<8x1xf32>
    %327 = vector.broadcast %326 : vector<8x1xf32> to vector<8x64xf32>
    %328 = arith.mulf %208, %327 : vector<8x64xf32>
    %cst_124 = arith.constant dense<0.000000e+00> : vector<64xf32>
    %329 = vector.multi_reduction <add>, %328, %cst_124 [0] : vector<8x64xf32> to vector<64xf32>
    %330 = vector.shape_cast %329 : vector<64xf32> to vector<1x64xf32>
    %331 = vector.broadcast %330 : vector<1x64xf32> to vector<8x64xf32>
    %332 = arith.mulf %298, %331 : vector<8x64xf32>
    %cst_125 = arith.constant dense<0.000000e+00> : vector<8x8xf32>
    %333 = tpu.matmul %332, %209, %cst_125 {dimension_numbers = #tpu.dot_dimension_numbers<[1], [0], [0], [1], [0, 0, 1, 1], [], []>} : vector<8x64xf32>, vector<64x8xf32>, vector<8x8xf32> -> vector<8x8xf32>
    %cst_126 = arith.constant dense<0.000000e+00> : vector<8x8xf32>
    %334 = tpu.matmul %333, %210, %cst_126 {dimension_numbers = #tpu.dot_dimension_numbers<[1], [0], [0], [1], [0, 0, 1, 1], [], []>} : vector<8x8xf32>, vector<8x8xf32>, vector<8x8xf32> -> vector<8x8xf32>
    %335 = vector.extract_strided_slice %222 {offsets = [8, 0], sizes = [8, 8], strides = [1, 1]} : vector<16x8xf32> to vector<8x8xf32>
    %cst_127 = arith.constant dense<0.000000e+00> : vector<8x8xf32>
    %336 = tpu.matmul %335, %322, %cst_127 {dimension_numbers = #tpu.dot_dimension_numbers<[1], [0], [0], [1], [0, 0, 1, 1], [], []>} : vector<8x8xf32>, vector<8x8xf32>, vector<8x8xf32> -> vector<8x8xf32>
    %337 = tpu.transpose %336, [1, 0] : vector<8x8xf32> -> vector<8x8xf32>
    %cst_128 = arith.constant dense<0.000000e+00> : vector<8x8xf32>
    %338 = tpu.matmul %334, %337, %cst_128 {dimension_numbers = #tpu.dot_dimension_numbers<[1], [0], [0], [1], [0, 0, 1, 1], [], []>} : vector<8x8xf32>, vector<8x8xf32>, vector<8x8xf32> -> vector<8x8xf32>
    %339 = arith.addf %338, %213 : vector<8x8xf32>
    %340 = arith.negf %339 : vector<8x8xf32>
    %341 = math.exp %340 : vector<8x8xf32>
    %cst_129 = arith.constant 1.000000e+00 : f32
    %342 = vector.broadcast %cst_129 : f32 to vector<8x8xf32>
    %343 = arith.addf %342, %341 : vector<8x8xf32>
    %344 = arith.divf %342, %343 : vector<8x8xf32>
    %cst_130 = arith.constant dense<0.000000e+00> : vector<8x8xf32>
    %345 = tpu.matmul %212, %344, %cst_130 {dimension_numbers = #tpu.dot_dimension_numbers<[1], [0], [0], [1], [0, 0, 1, 1], [], []>} : vector<8x8xf32>, vector<8x8xf32>, vector<8x8xf32> -> vector<8x8xf32>
    %cst_131 = arith.constant dense<0xFF800000> : vector<8xf32>
    %346 = vector.multi_reduction <maximumf>, %345, %cst_131 [0] : vector<8x8xf32> to vector<8xf32>
    %347 = vector.shape_cast %346 : vector<8xf32> to vector<1x8xf32>
    %348 = vector.broadcast %347 : vector<1x8xf32> to vector<8x8xf32>
    %349 = arith.subf %345, %348 : vector<8x8xf32>
    %350 = math.exp %349 : vector<8x8xf32>
    %cst_132 = arith.constant dense<0.000000e+00> : vector<8xf32>
    %351 = vector.multi_reduction <add>, %350, %cst_132 [0] : vector<8x8xf32> to vector<8xf32>
    %352 = vector.shape_cast %351 : vector<8xf32> to vector<1x8xf32>
    %353 = tpu.reciprocal %352 {approx = true} : vector<1x8xf32> -> vector<1x8xf32>
    %354 = vector.broadcast %353 : vector<1x8xf32> to vector<8x8xf32>
    %355 = arith.mulf %350, %354 : vector<8x8xf32>
    %356 = vector.extract_strided_slice %224 {offsets = [8, 0], sizes = [8, 192], strides = [1, 1]} : vector<16x192xf32> to vector<8x192xf32>
    %357 = arith.mulf %0, %355 : vector<8x8xf32>
    %358 = tpu.transpose %357, [1, 0] : vector<8x8xf32> -> vector<8x8xf32>
    %359 = vector.extract_strided_slice %356 {offsets = [0, 0], sizes = [8, 64], strides = [1, 1]} : vector<8x192xf32> to vector<8x64xf32>
    %cst_133 = arith.constant dense<0.000000e+00> : vector<8x64xf32>
    %360 = tpu.matmul %358, %359, %cst_133 {dimension_numbers = #tpu.dot_dimension_numbers<[1], [0], [0], [1], [0, 0, 1, 1], [], []>} : vector<8x8xf32>, vector<8x64xf32>, vector<8x64xf32> -> vector<8x64xf32>
    %361 = arith.mulf %1, %355 : vector<8x8xf32>
    %362 = tpu.transpose %361, [1, 0] : vector<8x8xf32> -> vector<8x8xf32>
    %363 = vector.extract_strided_slice %356 {offsets = [0, 64], sizes = [8, 64], strides = [1, 1]} : vector<8x192xf32> to vector<8x64xf32>
    %cst_134 = arith.constant dense<0.000000e+00> : vector<8x64xf32>
    %364 = tpu.matmul %362, %363, %cst_134 {dimension_numbers = #tpu.dot_dimension_numbers<[1], [0], [0], [1], [0, 0, 1, 1], [], []>} : vector<8x8xf32>, vector<8x64xf32>, vector<8x64xf32> -> vector<8x64xf32>
    %365 = arith.addf %360, %364 : vector<8x64xf32>
    %366 = arith.mulf %2, %355 : vector<8x8xf32>
    %367 = tpu.transpose %366, [1, 0] : vector<8x8xf32> -> vector<8x8xf32>
    %368 = vector.extract_strided_slice %356 {offsets = [0, 128], sizes = [8, 64], strides = [1, 1]} : vector<8x192xf32> to vector<8x64xf32>
    %cst_135 = arith.constant dense<0.000000e+00> : vector<8x64xf32>
    %369 = tpu.matmul %367, %368, %cst_135 {dimension_numbers = #tpu.dot_dimension_numbers<[1], [0], [0], [1], [0, 0, 1, 1], [], []>} : vector<8x8xf32>, vector<8x64xf32>, vector<8x64xf32> -> vector<8x64xf32>
    %370 = arith.addf %365, %369 : vector<8x64xf32>
    %371 = tpu.concatenate %297, %370 in 0 : vector<8x64xf32>, vector<8x64xf32> -> vector<16x64xf32>
    %cst_136 = arith.constant 0.000000e+00 : f32
    %372 = vector.broadcast %cst_136 : f32 to vector<16x64xf32>
    %373 = arith.maximumf %371, %372 : vector<16x64xf32>
    %cst_137 = arith.constant dense<0.000000e+00> : vector<16x64xf32>
    %374 = tpu.matmul %373, %214, %cst_137 {dimension_numbers = #tpu.dot_dimension_numbers<[1], [0], [0], [1], [0, 0, 1, 1], [], []>} : vector<16x64xf32>, vector<64x64xf32>, vector<16x64xf32> -> vector<16x64xf32>
    %cst_138 = arith.constant dense<0.000000e+00> : vector<16x64xf32>
    %375 = tpu.matmul %201, %215, %cst_138 {dimension_numbers = #tpu.dot_dimension_numbers<[1], [0], [0], [1], [0, 0, 1, 1], [], []>} : vector<16x64xf32>, vector<64x64xf32>, vector<16x64xf32> -> vector<16x64xf32>
    %376 = arith.addf %374, %375 : vector<16x64xf32>
    %377 = vector.broadcast %217 : vector<1x64xf32> to vector<16x64xf32>
    %378 = arith.addf %376, %377 : vector<16x64xf32>
    %cst_139 = arith.constant 0.000000e+00 : f32
    %379 = vector.broadcast %cst_139 : f32 to vector<16x64xf32>
    %380 = arith.maximumf %378, %379 : vector<16x64xf32>
    %cst_140 = arith.constant dense<0.000000e+00> : vector<16x64xf32>
    %381 = tpu.matmul %380, %3, %cst_140 {dimension_numbers = #tpu.dot_dimension_numbers<[1], [0], [0], [1], [0, 0, 1, 1], [], []>} : vector<16x64xf32>, vector<64x64xf32>, vector<16x64xf32> -> vector<16x64xf32>
    %382 = arith.mulf %380, %380 : vector<16x64xf32>
    %cst_141 = arith.constant dense<0.000000e+00> : vector<16x64xf32>
    %383 = tpu.matmul %382, %3, %cst_141 {dimension_numbers = #tpu.dot_dimension_numbers<[1], [0], [0], [1], [0, 0, 1, 1], [], []>} : vector<16x64xf32>, vector<64x64xf32>, vector<16x64xf32> -> vector<16x64xf32>
    %384 = arith.mulf %381, %381 : vector<16x64xf32>
    %385 = arith.subf %383, %384 : vector<16x64xf32>
    %cst_142 = arith.constant 0.000000e+00 : f32
    %386 = vector.broadcast %cst_142 : f32 to vector<16x64xf32>
    %387 = arith.maximumf %385, %386 : vector<16x64xf32>
    %388 = arith.subf %380, %381 : vector<16x64xf32>
    %cst_143 = arith.constant 9.99999974E-6 : f32
    %389 = vector.broadcast %cst_143 : f32 to vector<16x64xf32>
    %390 = arith.addf %387, %389 : vector<16x64xf32>
    %391 = math.rsqrt %390 : vector<16x64xf32>
    %392 = arith.mulf %388, %391 : vector<16x64xf32>
    %393 = vector.broadcast %218 : vector<1x64xf32> to vector<16x64xf32>
    %394 = arith.mulf %392, %393 : vector<16x64xf32>
    %395 = vector.broadcast %219 : vector<1x64xf32> to vector<16x64xf32>
    %396 = arith.addf %394, %395 : vector<16x64xf32>
    %cst_144 = arith.constant dense<0.000000e+00> : vector<16x4xf32>
    %397 = tpu.matmul %396, %4, %cst_144 {dimension_numbers = #tpu.dot_dimension_numbers<[1], [0], [0], [1], [0, 0, 1, 1], [], []>} : vector<16x64xf32>, vector<64x4xf32>, vector<16x4xf32> -> vector<16x4xf32>
    %398 = vector.broadcast %5 : vector<1x4xf32> to vector<16x4xf32>
    %399 = arith.addf %397, %398 : vector<16x4xf32>
    %c0_145 = arith.constant 0 : index
    %c0_146 = arith.constant 0 : index
    %400 = vector.load %arg3[%c0_145, %c0_146] : memref<16x4xf32, #tpu.memory_space<vmem>>, vector<16x4xf32>
    tpu.vector_store %arg3[%c0_145, %c0_146], %399 {strides = array<i32>} : memref<16x4xf32, #tpu.memory_space<vmem>>, vector<16x4xf32>,
    return
  }
}

</mosaic_0001>

<bundles_post_ra>
// kernel: forward.1
= control target key start
LH: loop header
LB: loop body
LE: loop exit
PB: predicated region body
PF: predicated region fallthrough
CT: control target
= control target key end

     0   :  { %vm78_vm0 = vcmask 261120   ;;  %v7257_v8 = vmov 0.0   ;;  %vm7258_vm1 = vmmov 0   ;;  %vm386_vm2 = vcmask 64512   ;;  %s7260_s12 = smov 64   ;;  %s8330_s1 = inlined_call_operand.vmem [shape: f32[832,64], index: 1, kind: input, shape index: {}]   ;;  %s8331_s0 = inlined_call_operand.vmem [shape: f32[16,32], index: 0, kind: input, shape index: {}]   ;;  %s8332_s2 = inlined_call_operand.vmem [shape: f32[96,192], index: 2, kind: input, shape index: {}]   ;;  %s8333_s3 = inlined_call_operand.vmem [shape: f32[16,4], index: 3, kind: output, shape index: {}]  }
   0x1   :  { %v38_v0 = vld [vmem:[%s8330_s1 + $0xb0] sm:$0xff]  ;;  %v39_v1 = vld [vmem:[%s8330_s1 + $0xb8] sm:$0xff]  ;;  %v40_v2 = vld [vmem:[%s8330_s1 + $0xc0] sm:$0xff]  ;;  %vm460_vm3 = vcmask 31744   ;;  %v7259_v20 = vmov 0.0|0.0   ;;  %vm235_vm4 = vcmask 130048   ;;  %v562_v47 = vlaneseq }
   0x2   :  { %v6872_v3 = vpack.c.bf16 %v39_v1, %v38_v0  ;;  %v41_v4 = vld [vmem:[%s8330_s1 + $0xc8] sm:$0xff]  ;;  %v7296_v5 = vld [vmem:[%s8331_s0] sm:$0xff]  ;;  %v51_v9 = vld [vmem:[%s8330_s1 + $0x118] sm:$0xff]  ;;  %vm473_vm5 = vcmask 1043456   ;;  %vm2608_vm6 = vcmask 523264  }
   0x3   :  { %v6876_v6 = vpack.c.bf16 %v41_v4, %v40_v2  ;;  %6299 = vmatprep.mubr.msk.f32.mxu0 %vm78_vm0, %v7296_v5  ;;  %6310 = vmatprep.mubr.msk.f32.mxu1 %vm78_vm0, %v7296_v5  ;;  %v7305_v7 = vld [vmem:[%s8331_s0 + $0x8] sm:$0xff]  ;;  %v52_v10 = vld [vmem:[%s8330_s1 + $0x120] sm:$0xff]  ;;  %v54_v13 = vld [vmem:[%s8330_s1 + $0x130] sm:$0xff]  ;;  %v7424_v48 = vshrl.u32 %v562_v47, 7 }
   0x4   :  { %6873 = vmatprep.subr.bf16.mxu0 %v6872_v3  ;;  %v53_v11 = vld [vmem:[%s8330_s1 + $0x128] sm:$0xff]  ;;  %v6880_v12 = vpack.c.bf16 %v52_v10, %v51_v9  ;;  %v7340_v18 = vld [vmem:[%s8330_s1 + $0xf0] sm:$0xff]  ;;  %v6889_v19 = vpack.c.bf16 %v7305_v7, %v7296_v5  ;;  %v36_v21 = vld [vmem:[%s8330_s1 + $0xa0] sm:$0x3] }
   0x5   :  { %6875 = vmatpush3.bf16.msra.mxu0 %v6872_v3  ;;  %v6884_v14 = vpack.c.bf16 %v54_v13, %v53_v11  ;;  %v7333_v16 = vld [vmem:[%s8330_s1 + $0xa8] sm:$0xf]  ;;  %v73_v23 = vld [vmem:[%s8332_s2 + $0x18] sm:$0xff]  ;;  %v70_v24 = vld [vmem:[%s8332_s2] sm:$0xff]  ;;  %v7427_v49 = vsub.s32 0, %v7424_v48 }
   0x6   :  { %6877 = vmatprep.subr.bf16.mxu0 %v6876_v6  ;;  %6881 = vmatprep.subr.bf16.mxu1 %v6880_v12  ;;  %v71_v22 = vld [vmem:[%s8332_s2 + $0x8] sm:$0xff]  ;;  %v72_v26 = vld [vmem:[%s8332_s2 + $0x10] sm:$0xff]  ;;  %v77_v28 = vld [vmem:[%s8332_s2 + $0x38] sm:$0xff] }
   0x7   :  { %6883 = vmatpush3.bf16.msra.mxu1 %v6880_v12  ;;  %v6891_v25 = vpack.c.bf16 %v73_v23, %v71_v22  ;;  %v75_v27 = vld [vmem:[%s8332_s2 + $0x28] sm:$0xff]  ;;  %v6893_v29 = vpack.c.bf16 %v72_v26, %v70_v24  ;;  %v74_v31 = vld [vmem:[%s8332_s2 + $0x20] sm:$0xff]  ;;  %v76_v32 = vld [vmem:[%s8332_s2 + $0x30] sm:$0xff] }
   0x8   :  { %6885 = vmatprep.subr.bf16.mxu1 %v6884_v14  ;;  %v6895_v30 = vpack.c.bf16 %v77_v28, %v75_v27  ;;  %v6897_v33 = vpack.c.bf16 %v76_v32, %v74_v31  ;;  %v7387_v35 = vld [vmem:[%s8330_s1 + $0xf8] sm:$0xff]  ;;  %v7393_v37 = vld [vmem:[%s8330_s1 + $0x100] sm:$0xff]  ;;  %v7404_v38 = vld [vmem:[%s8330_s1 + $0x108] sm:$0xff] }
   0x9   :  { %6879 = vmatpush3.bf16.msra.mxu0 %v6876_v6  ;;  %v7434_v55 = vld [vmem:[%s8330_s1 + $0xe8] sm:$0xff]  ;;  %v7440_v59 = vpack.c.bf16 %v7387_v35, %v7340_v18  ;;  %v7446_v60 = vpack.c.bf16 %v7404_v38, %v7393_v37  ;;  %v7457_v61 = vld [vmem:[%s8330_s1 + $0xd8] sm:$0xff]  ;;  %v7463_v4 = vld [vmem:[%s8330_s1 + $0xd0] sm:$0xff] }
   0xa   :  { %6320 = vmatprep.subr.mxu0 %v7257_v8  ;;  %v7486_v47 = vld [vmem:[%s8330_s1 + $0x110] sm:$0xf] }
   0xb   :  { %6887 = vmatpush3.bf16.msra.mxu1 %v6884_v14 }
   0xc   :  { %6300 = vmatmul.mubr.msk.f32.vlgmr.msra.gmra.mrb[0].mxu0 %vm78_vm0, %v7305_v7  ;;  %6888 = vmatprep.subr.bf16.mxu1 %v7259_v20 }
   0xd   :  { %6322 = vmatprep.mubr.msk.f32.mxu0 %vm7258_vm1, %v7257_v8 }
   0xe   :  { %6311 = vmatmul.mubr.msk.f32.vlgmr.msra.gmra.mrb[0].mxu1 %vm78_vm0, %v7305_v7 }
   0xf   :  { %6317 = vmatprep.mubr.msk.f32.mxu1 %vm7258_vm1, %v7257_v8  ;;  %6890 = vmatpush3.bf16.msra.mxu1 %v6889_v19 }
  0x10   :  { %6892 = vmatprep.subr.bf16.mxu1 %v6891_v25 }
  0x12   :  { %6318 = vmatmul.mubr.msk.f32.vlgmr.msra.gmra.mrb[2].mxu1 %vm235_vm4, %v36_v21 }
  0x13   :  { %373 = vmatprep.mubr.f32.mxu1 %v7257_v8  ;;  %6894 = vmatpush1.bf16.msra.mxu1 %v6893_v29 }
  0x14   :  { %6896 = vmatprep.subr.bf16.mxu1 %v6895_v30 }
  0x17   :  { %6898 = vmatpush1.bf16.msra.mxu1 %v6897_v33  ;;  %v7475_v33 = vld [vmem:[%s8330_s1 + $0xe0] ss:$0 sm:$0xff] }
  0x18   :  { %6899 = vmatprep.subr.bf16.mxu1 %v7259_v20 }
  0x1a   :  { %5897 = vmatmul.mubr.msk.f32.vlgmr.msra.gmra.mrb[4].mxu1 %vm78_vm0, %v7296_v5 }
  0x1b   :  { %379 = vmatprep.mubr.f32.mxu1 %v7257_v8 }
  0x1e   :  { %5898 = vmatmul.mubr.msk.f32.gmra.mrb[6].mxu1 %vm78_vm0, %v7305_v7 }
  0x1f   :  { %6341 = vmatprep.mubr.msk.f32.mxu1 %vm7258_vm1, %v7257_v8 }
  0xdf   :  { %v7328_v15 = vpop.f32.mrb[0].mxu0 }
  0xe0   :  { %v151_v17 = vpop.f32.mrb[1].mxu0 }
  0xe1   :  { %6321 = vmatpush3.msra.mxu0 %v151_v17  ;;  %v7410_v39 = vpop.f32.mrb[0].mxu1 }
  0xe2   :  { %6323 = vmatmul.mubr.msk.f32.vlgmr.msra.gmra.mrb[2].mxu0 %vm386_vm2, %v7333_v16  ;;  %v7412_v40 = vpop.f32.mrb[1].mxu1 }
  0xe3   :  { %6327 = vmatprep.mubr.msk.f32.mxu0 %vm460_vm3, %v7340_v18 }
  0xe5   :  { %v7414_v41 = vpop.f32.mrb[2].mxu1 }
  0xe6   :  { %v6319_v42 = vpop.f32.mrb[3].mxu1  ;;  %v565_v53 = vrot.slane %v7414_v41, %v7427_v49 }
  0xe8   :  { %v566_v58 = vmul.f32 %v565_v53, %v7434_v55 }
  0xed   :  { %v7416_v43 = vpop.f32.mrb[4].mxu1 }
  0xee   :  { %v7418_v44 = vpop.f32.mrb[5].mxu1 }
  0xf1   :  { %v7420_v45 = vpop.f32.mrb[6].mxu1 }
  0xf2   :  { %v7422_v46 = vpop.f32.mrb[7].mxu1 }
 0x1b5   :  { %v456_v34 = vpop.f32.mrb[2].mxu0 }
 0x1b6   :  { %v6324_v36 = vpop.f32.mrb[3].mxu0  ;;  %6325 = vmatprep.subr.msk.mxu0 %vm473_vm5, %v456_v34 }
 0x1b7   :  { %6326 = vmatpush3.msk.msra.mxu0 %vm473_vm5, %v456_v34 }
 0x1b8   :  { %6328 = vmatmul.mubr.msk.f32.vlgmr.msra.gmra.mrb[4].mxu0 %vm460_vm3, %v7387_v35  ;;  %6344 = vmatprep.subr.mxu0 %v7257_v8 }
 0x1b9   :  { %6330 = vmatprep.mubr.msk.f32.mxu0 %vm460_vm3, %v7393_v37 }
 0x1bc   :  { %6331 = vmatmul.mubr.msk.f32.gmra.mrb[6].mxu0 %vm460_vm3, %v7404_v38 }
 0x1bd   :  { %6346 = vmatprep.mubr.msk.f32.mxu0 %vm7258_vm1, %v7257_v8 }
 0x28b   :  { %v6329_v50 = vpop.f32.mrb[4].mxu0 }
 0x28c   :  { %v543_v51 = vpop.f32.mrb[5].mxu0 }
 0x28d   :  { %v6900_v52 = vpack.c.bf16 %v6329_v50, %v543_v51 }
 0x28f   :  { %v6332_v54 = vpop.f32.mrb[6].mxu0  ;;  %6901 = vmatpush3.bf16.msra.mxu1 %v6900_v52 }
 0x290   :  { %v553_v56 = vpop.f32.mrb[7].mxu0  ;;  %6902 = vmatprep.subr.bf16.mxu1 %v7259_v20 }
 0x291   :  { %v6903_v57 = vpack.c.bf16 %v6332_v54, %v553_v56 }
 0x293   :  { %6904 = vmatpush3.bf16.msra.mxu1 %v6903_v57 }
 0x294   :  { %6905 = vmatprep.subr.bf16.mxu1 %v7259_v20 }
 0x296   :  { %6342 = vmatmul.mubr.msk.f32.vlgmr.msra.gmra.mrb[8].mxu1 %vm78_vm0, %v566_v58 }
 0x297   :  { %6907 = vmatpush3.bf16.msra.mxu1 %v7440_v59  ;;  %6357 = vmatprep.mubr.msk.f32.mxu1 %vm7258_vm1, %v7257_v8 }
 0x298   :  { %6908 = vmatprep.subr.bf16.mxu1 %v7259_v20 }
 0x29b   :  { %6910 = vmatpush3.bf16.msra.mxu1 %v7446_v60 }
 0x29c   :  { %6370 = vmatprep.subr.mxu1 %v7257_v8 }
 0x369   :  { %v636_v62 = vpop.f32.mrb[8].mxu1 }
 0x36a   :  { %v637_v63 = vadd.f32 %v636_v62, %v7457_v61  ;;  %v6343_v0 = vpop.f32.mrb[9].mxu1 }
 0x36c   :  { %v5906_v1 = vmul.f32 -1.442695, %v637_v63 }
 0x36e   :  { %7182 = vpow2.f32 %v5906_v1 }
 0x378   :  { %v7183_v2 = vpop.eup %7182 }
 0x379   :  { %v643_v3 = vadd.f32 1.0, %v7183_v2 }
 0x37b   :  { %7184 = vrcp.f32 %v643_v3 }
 0x385   :  { %v7185_v6 = vpop.eup %7184 }
 0x386   :  { %6345 = vmatpush3.msra.mxu0 %v7185_v6 }
 0x387   :  { %6347 = vmatmul.mubr.msk.f32.vlgmr.msra.gmra.mrb[8].mxu0 %vm386_vm2, %v7463_v4  ;;  %6360 = vmatprep.subr.mxu0 %v7257_v8 }
 0x388   :  { %6362 = vmatprep.mubr.msk.f32.mxu0 %vm7258_vm1, %v7257_v8  ;;  %6361 = vmatpush3.msk.msra.mxu0 %vm473_vm5, %v7486_v47 }
 0x389   :  { %6365 = vmatprep.subr.mxu0 %v7257_v8 }
 0x45a   :  { %v715_v9 = vpop.f32.mrb[8].mxu0 }
 0x45b   :  { %v719_v10 = vsel %vm386_vm2, %v715_v9, -inf  ;;  %v6348_v11 = vpop.f32.mrb[9].mxu0 }
 0x45c   :  { %v720_v12 = vrot.slane %v719_v10, 4 }
 0x45e   :  { %v721_v13 = vmax.f32 %v719_v10, %v720_v12 }
 0x460   :  { %v722_v14 = vrot.slane %v721_v13, 2 }
 0x462   :  { %v723_v17 = vmax.f32 %v721_v13, %v722_v14 }
 0x464   :  { %v724_v19 = vrot.slane %v723_v17, 1 }
 0x466   :  { %v725_v21 = vmax.f32 %v723_v17, %v724_v19 }
 0x468   :  { %v726_v22 = vsub.f32 %v715_v9, %v725_v21  ;;  %v7520_v21 = vld [vmem:[%s8330_s1 + $0x138] sm:$0xff] }
 0x46a   :  { %v727_v23 = vmul.f32 1.442695, %v726_v22 }
 0x46c   :  { %7186 = vpow2.f32 %v727_v23 }
 0x476   :  { %v7187_v24 = vpop.eup %7186 }
 0x477   :  { %v729_v25 = vsel %vm386_vm2, %v7187_v24, 0.0 }
 0x478   :  { %v730_v26 = vrot.slane %v729_v25, 4 }
 0x47a   :  { %v731_v27 = vadd.f32 %v730_v26, %v729_v25 }
 0x47c   :  { %v732_v28 = vrot.slane %v731_v27, 2 }
 0x47e   :  { %v733_v29 = vadd.f32 %v732_v28, %v731_v27 }
 0x480   :  { %v734_v30 = vrot.slane %v733_v29, 1 }
 0x482   :  { %v735_v31 = vadd.f32 %v734_v30, %v733_v29 }
 0x484   :  { %7188 = vrcp.f32 %v735_v31 }
 0x48e   :  { %v7189_v32 = vpop.eup %7188 }
 0x48f   :  { %v737_v34 = vmul.f32 %v7189_v32, %v7187_v24 }
 0x491   :  { %v742_v36 = vmul.f32 %v7475_v33, %v737_v34 }
 0x493   :  { %v743_v42 = vsel %vm386_vm2, %v742_v36, 0.0 }
 0x494   :  { %744 = vadd.xlane.f32.xlu0 %v743_v42 }
 0x4aa   :  { %1218 = vrot.lane.b32.xlu0 %v7416_v43, %s7260_s12 }
 0x4ae   :  { %2275 = vrot.lane.b32.xlu0 %v7420_v45, %s7260_s12 }
 0x521   :  { %v745_v50 = vpop.xlane.xlu0 %744 }
 0x522   :  { %v746_v51 = vmul.f32 %v745_v50, %v7434_v55 }
 0x524   :  { %v747_v52 = vsel %vm78_vm0, %v746_v51, 0.0 }
 0x525   :  { %v748_v53 = vrot.slane %v747_v52, 4  ;;  %v1219_v10 = vpop.permute.xlu0 %1218 }
 0x527   :  { %v749_v54 = vadd.f32 %v748_v53, %v747_v52 }
 0x529   :  { %v750_v56 = vrot.slane %v749_v54, 2 }
 0x52b   :  { %v751_v57 = vadd.f32 %v750_v56, %v749_v54 }
 0x52d   :  { %v752_v58 = vrot.slane %v751_v57, 1 }
 0x52f   :  { %v753_v62 = vadd.f32 %v752_v58, %v751_v57  ;;  %v7554_v57 = vld [vmem:[%s8330_s1] sm:$0xff] }
 0x531   :  { %v754_v63 = vmul.f32 %v753_v62, %v7296_v5  ;;  %v7560_v62 = vld [vmem:[%s8330_s1 + $0x10] sm:$0xff] }
 0x533   :  { %6358 = vmatmul.mubr.msk.f32.vlgmr.msra.gmra.mrb[10].mxu1 %vm78_vm0, %v754_v63 }
 0x534   :  { %6372 = vmatprep.mubr.msk.f32.mxu1 %vm7258_vm1, %v7257_v8 }
 0x606   :  { %v824_v0 = vpop.f32.mrb[10].mxu1 }
 0x607   :  { %v6359_v1 = vpop.f32.mrb[11].mxu1  ;;  %6363 = vmatmul.mubr.msk.f32.vlgmr.msra.gmra.mrb[10].mxu0 %vm460_vm3, %v824_v0 }
 0x608   :  { %6366 = vmatpush3.msra.mxu0 %v737_v34  ;;  %6367 = vmatprep.mubr.msk.f32.mxu0 %vm7258_vm1, %v7257_v8 }
 0x609   :  { %6375 = vmatprep.subr.mxu0 %v7257_v8 }
 0x60b   :  { %6368 = vmatmul.mubr.msk.f32.vlgmr.msra.gmra.mrb[12].mxu0 %vm386_vm2, %v7412_v40  ;;  %v7514_v40 = vld [vmem:[%s8330_s1 + $0x140] sm:$0xff] }
 0x60c   :  { %6377 = vmatprep.mubr.msk.f32.mxu0 %vm7258_vm1, %v7257_v8 }
 0x6da   :  { %v900_v2 = vpop.f32.mrb[10].mxu0 }
 0x6db   :  { %v6364_v3 = vpop.f32.mrb[11].mxu0 }
 0x6dc   :  { %v7574_v3 = vsub.s32 1, %v7424_v48 }
 0x6de   :  { %v973_v6 = vpop.f32.mrb[12].mxu0 }
 0x6df   :  { %v6369_v9 = vpop.f32.mrb[13].mxu0  ;;  %6371 = vmatpush3.xpose.msk.msra.mxu1 %vm386_vm2, %v973_v6 }
 0x6e0   :  { %6380 = vmatprep.subr.mxu1 %v7257_v8 }
 0x6e2   :  { %6373 = vmatmul.mubr.msk.f32.vlgmr.msra.gmra.mrb[12].mxu1 %vm386_vm2, %v900_v2 }
 0x6e3   :  { %6381 = vmatpush3.msra.mxu1 %v1219_v10  ;;  %6382 = vmatprep.mubr.msk.f32.mxu1 %vm7258_vm1, %v7257_v8  ;;  %v1635_v10 = vrot.slane %v7414_v41, %v7574_v3 }
 0x6e4   :  { %6385 = vmatprep.subr.mxu1 %v7257_v8 }
 0x7b5   :  { %v1049_v11 = vpop.f32.mrb[12].mxu1 }
 0x7b6   :  { %v1050_v12 = vadd.f32 %v1049_v11, %v7514_v40  ;;  %v6374_v13 = vpop.f32.mrb[13].mxu1 }
 0x7b8   :  { %v5915_v14 = vmul.f32 -1.442695, %v1050_v12  ;;  %v1636_v12 = vmul.f32 %v1635_v10, %v7434_v55 }
 0x7ba   :  { %7190 = vpow2.f32 %v5915_v14 }
 0x7c4   :  { %v7191_v17 = vpop.eup %7190 }
 0x7c5   :  { %v1056_v19 = vadd.f32 1.0, %v7191_v17 }
 0x7c7   :  { %7192 = vrcp.f32 %v1056_v19 }
 0x7d1   :  { %v7193_v22 = vpop.eup %7192 }
 0x7d2   :  { %6376 = vmatpush3.msra.mxu0 %v7193_v22 }
 0x7d3   :  { %6378 = vmatmul.mubr.msk.f32.vlgmr.msra.gmra.mrb[14].mxu0 %vm386_vm2, %v7520_v21  ;;  %6395 = vmatprep.subr.mxu0 %v7257_v8 }
 0x7d4   :  { %6396 = vmatpush3.msra.mxu0 %v7328_v15  ;;  %6397 = vmatprep.mubr.msk.f32.mxu0 %vm7258_vm1, %v7257_v8 }
 0x7d7   :  { %6398 = vmatmul.mubr.msk.f32.vlgmr.msra.gmra.mrb[16].mxu0 %vm386_vm2, %v7333_v16 }
 0x7d8   :  { %6402 = vmatprep.mubr.msk.f32.mxu0 %vm460_vm3, %v7340_v18 }
 0x8a6   :  { %v1128_v23 = vpop.f32.mrb[14].mxu0 }
 0x8a7   :  { %v1132_v24 = vsel %vm386_vm2, %v1128_v23, -inf  ;;  %v6379_v25 = vpop.f32.mrb[15].mxu0 }
 0x8a8   :  { %v1133_v26 = vrot.slane %v1132_v24, 4 }
 0x8aa   :  { %v1134_v27 = vmax.f32 %v1132_v24, %v1133_v26  ;;  %v1540_v28 = vpop.f32.mrb[16].mxu0 }
 0x8ab   :  { %v6399_v29 = vpop.f32.mrb[17].mxu0  ;;  %6400 = vmatprep.subr.msk.mxu0 %vm473_vm5, %v1540_v28 }
 0x8ac   :  { %v1135_v15 = vrot.slane %v1134_v27, 2  ;;  %6401 = vmatpush3.msk.msra.mxu0 %vm473_vm5, %v1540_v28 }
 0x8ad   :  { %6403 = vmatmul.mubr.msk.f32.vlgmr.msra.gmra.mrb[18].mxu0 %vm460_vm3, %v7387_v35  ;;  %6911 = vmatprep.subr.bf16.mxu0 %v7259_v20 }
 0x8ae   :  { %v1136_v16 = vmax.f32 %v1134_v27, %v1135_v15  ;;  %6405 = vmatprep.mubr.msk.f32.mxu0 %vm460_vm3, %v7393_v37 }
 0x8b0   :  { %v1137_v18 = vrot.slane %v1136_v16, 1 }
 0x8b1   :  { %6406 = vmatmul.mubr.msk.f32.gmra.mrb[20].mxu0 %vm460_vm3, %v7404_v38  ;;  %v7548_v38 = vld [vmem:[%s8330_s1 + $0x8] sm:$0xff] }
 0x8b2   :  { %v1138_v30 = vmax.f32 %v1136_v16, %v1137_v18  ;;  %6416 = vmatprep.mubr.msk.f32.mxu0 %vm7258_vm1, %v7257_v8 }
 0x8b4   :  { %v1139_v31 = vsub.f32 %v1128_v23, %v1138_v30 }
 0x8b6   :  { %v1140_v32 = vmul.f32 1.442695, %v1139_v31 }
 0x8b8   :  { %7194 = vpow2.f32 %v1140_v32 }
 0x8c2   :  { %v7195_v34 = vpop.eup %7194 }
 0x8c3   :  { %v1142_v35 = vsel %vm386_vm2, %v7195_v34, 0.0 }
 0x8c4   :  { %v1143_v36 = vrot.slane %v1142_v35, 4 }
 0x8c6   :  { %v1144_v42 = vadd.f32 %v1143_v36, %v1142_v35 }
 0x8c8   :  { %v1145_v50 = vrot.slane %v1144_v42, 2 }
 0x8ca   :  { %v1146_v51 = vadd.f32 %v1145_v50, %v1144_v42 }
 0x8cc   :  { %v1147_v52 = vrot.slane %v1146_v51, 1 }
 0x8ce   :  { %v1148_v37 = vadd.f32 %v1147_v52, %v1146_v51 }
 0x8d0   :  { %7196 = vrcp.f32 %v1148_v37 }
 0x8da   :  { %v7197_v53 = vpop.eup %7196 }
 0x8db   :  { %v1150_v54 = vmul.f32 %v7197_v53, %v7195_v34 }
 0x8dd   :  { %v1184_v56 = vmul.f32 %v1150_v54, %v7548_v38  ;;  %v1151_v58 = vmul.f32 %v1150_v54, %v7554_v57  ;;  %v1367_v63 = vmul.f32 %v1150_v54, %v7560_v62 }
 0x8df   :  { %1185 = vxpose.xlu1.b32.start.end [1/1] (short) (narrow) %v1184_v56, 8 }
 0x8e3   :  { %1152 = vxpose.xlu1.b32.start.end [1/1] (short) (narrow) %v1151_v58, 8 }
 0x8e7   :  { %1368 = vxpose.xlu1.b32.start.end [1/1] (short) (narrow) %v1367_v63, 8 }
 0x95f   :  { %v1201_v0 = vpop.trf.xlu1 }
 0x960   :  { %6383 = vmatmul.mubr.msk.f32.vlgmr.msra.gmra.mrb[14].mxu1 %vm386_vm2, %v1201_v0 }
 0x961   :  { %6386 = vmatpush3.msra.mxu1 %v7416_v43  ;;  %6387 = vmatprep.mubr.msk.f32.mxu1 %vm7258_vm1, %v7257_v8 }
 0x962   :  { %6390 = vmatprep.subr.mxu1 %v7257_v8 }
 0x963   :  { %v1168_v1 = vpop.trf.xlu1 }
 0x967   :  { %v1384_v41 = vpop.trf.xlu1 }
 0x968   :  { %6388 = vmatmul.mubr.msk.f32.vlgmr.msra.gmra.mrb[14].mxu1 %vm386_vm2, %v1168_v1 }
 0x969   :  { %6391 = vmatpush3.msra.mxu1 %v7418_v44  ;;  %6392 = vmatprep.mubr.msk.f32.mxu1 %vm7258_vm1, %v7257_v8 }
 0x96a   :  { %6419 = vmatprep.subr.mxu1 %v7257_v8 }
 0x970   :  { %6393 = vmatmul.mubr.msk.f32.vlgmr.msra.gmra.mrb[14].mxu1 %vm386_vm2, %v1384_v41  ;;  %v2276_v41 = vpop.permute.xlu0 %2275 }
 0x971   :  { %6421 = vmatprep.mubr.msk.f32.mxu1 %vm7258_vm1, %v7257_v8 }
 0x980   :  { %v6404_v2 = vpop.f32.mrb[18].mxu0 }
 0x981   :  { %v1613_v43 = vpop.f32.mrb[19].mxu0 }
 0x982   :  { %v6912_v6 = vpack.c.bf16 %v6404_v2, %v1613_v43 }
 0x984   :  { %v6407_v9 = vpop.f32.mrb[20].mxu0  ;;  %6913 = vmatpush3.bf16.msra.mxu0 %v6912_v6 }
 0x985   :  { %v1623_v11 = vpop.f32.mrb[21].mxu0  ;;  %6914 = vmatprep.subr.bf16.mxu0 %v7259_v20 }
 0x986   :  { %v6915_v44 = vpack.c.bf16 %v6407_v9, %v1623_v11 }
 0x988   :  { %6916 = vmatpush3.bf16.msra.mxu0 %v6915_v44 }
 0x989   :  { %6435 = vmatprep.subr.mxu0 %v7257_v8 }
 0x98b   :  { %6417 = vmatmul.mubr.msk.f32.vlgmr.msra.gmra.mrb[22].mxu0 %vm78_vm0, %v1636_v12 }
 0x98c   :  { %6436 = vmatpush3.msk.msra.mxu0 %vm473_vm5, %v7486_v47  ;;  %6437 = vmatprep.mubr.msk.f32.mxu0 %vm7258_vm1, %v7257_v8 }
 0x98d   :  { %6440 = vmatprep.subr.mxu0 %v7257_v8 }
 0xa5e   :  { %v1706_v13 = vpop.f32.mrb[22].mxu0 }
 0xa5f   :  { %v1707_v14 = vadd.f32 %v1706_v13, %v7457_v61  ;;  %v6418_v17 = vpop.f32.mrb[23].mxu0  ;;  %v7600_v61 = vpop.f32.mrb[14].mxu1 }
 0xa60   :  { %v6394_v24 = vpop.f32.mrb[15].mxu1 }
 0xa61   :  { %v5927_v19 = vmul.f32 -1.442695, %v1707_v14  ;;  %v67_v24 = vld [vmem:[%s8330_s1 + $0x198] sm:$0xff] }
 0xa63   :  { %7198 = vpow2.f32 %v5927_v19 }
 0xa6d   :  { %v7199_v22 = vpop.eup %7198 }
 0xa6e   :  { %v1713_v23 = vadd.f32 1.0, %v7199_v22 }
 0xa70   :  { %7200 = vrcp.f32 %v1713_v23  ;;  %v65_v23 = vld [vmem:[%s8330_s1 + $0x188] sm:$0xff] }
 0xa7a   :  { %v7201_v47 = vpop.eup %7200 }
 0xa7b   :  { %6420 = vmatpush3.msra.mxu1 %v7201_v47  ;;  %v66_v47 = vld [vmem:[%s8330_s1 + $0x190] sm:$0xff] }
 0xa7c   :  { %6422 = vmatmul.mubr.msk.f32.vlgmr.msra.gmra.mrb[16].mxu1 %vm386_vm2, %v7463_v4  ;;  %6917 = vmatprep.subr.bf16.mxu1 %v7259_v20 }
 0xa7d   :  { %6919 = vmatpush3.bf16.msra.mxu1 %v7440_v59  ;;  %6432 = vmatprep.mubr.msk.f32.mxu1 %vm7258_vm1, %v7257_v8 }
 0xa7e   :  { %6920 = vmatprep.subr.bf16.mxu1 %v7259_v20 }
 0xa81   :  { %6922 = vmatpush3.bf16.msra.mxu1 %v7446_v60 }
 0xa82   :  { %6445 = vmatprep.subr.mxu1 %v7257_v8 }
 0xb4f   :  { %v1782_v25 = vpop.f32.mrb[16].mxu1 }
 0xb50   :  { %v1786_v26 = vsel %vm386_vm2, %v1782_v25, -inf  ;;  %v6423_v4 = vpop.f32.mrb[17].mxu1 }
 0xb51   :  { %v1787_v27 = vrot.slane %v1786_v26, 4 }
 0xb53   :  { %v1788_v28 = vmax.f32 %v1786_v26, %v1787_v27  ;;  %v2531_v27 = vmax.f32 %v7600_v61, 0.0 }
 0xb55   :  { %v1789_v29 = vrot.slane %v1788_v28, 2 }
 0xb57   :  { %v1790_v59 = vmax.f32 %v1788_v28, %v1789_v29 }
 0xb59   :  { %v1791_v15 = vrot.slane %v1790_v59, 1 }
 0xb5b   :  { %v1792_v16 = vmax.f32 %v1790_v59, %v1791_v15 }
 0xb5d   :  { %v1793_v18 = vsub.f32 %v1782_v25, %v1792_v16  ;;  %v6923_v25 = vpack.c.bf16 %v66_v47, %v65_v23  ;;  %v23_v23 = vld [vmem:[%s8330_s1 + $0x48] sm:$0xff]  ;;  %v24_v47 = vld [vmem:[%s8330_s1 + $0x50] sm:$0xff] }
 0xb5f   :  { %v1794_v30 = vmul.f32 1.442695, %v1793_v18 }
 0xb61   :  { %7202 = vpow2.f32 %v1794_v30 }
 0xb6b   :  { %v7203_v31 = vpop.eup %7202 }
 0xb6c   :  { %v1796_v60 = vsel %vm386_vm2, %v7203_v31, 0.0 }
 0xb6d   :  { %v1797_v32 = vrot.slane %v1796_v60, 4 }
 0xb6f   :  { %v1798_v34 = vadd.f32 %v1797_v32, %v1796_v60 }
 0xb71   :  { %v1799_v35 = vrot.slane %v1798_v34, 2 }
 0xb73   :  { %v1800_v36 = vadd.f32 %v1799_v35, %v1798_v34 }
 0xb75   :  { %v1801_v42 = vrot.slane %v1800_v36, 1 }
 0xb77   :  { %v1802_v50 = vadd.f32 %v1801_v42, %v1800_v36 }
 0xb79   :  { %7204 = vrcp.f32 %v1802_v50 }
 0xb83   :  { %v7205_v51 = vpop.eup %7204 }
 0xb84   :  { %v1804_v52 = vmul.f32 %v7205_v51, %v7203_v31 }
 0xb86   :  { %v1805_v37 = vmul.f32 %v7475_v33, %v1804_v52 }
 0xb88   :  { %v1806_v53 = vsel %vm386_vm2, %v1805_v37, 0.0 }
 0xb89   :  { %1807 = vadd.xlane.f32.xlu1 %v1806_v53 }
 0xc16   :  { %v1808_v54 = vpop.xlane.xlu1 %1807 }
 0xc17   :  { %v1809_v56 = vmul.f32 %v1808_v54, %v7434_v55 }
 0xc19   :  { %v1810_v58 = vsel %vm78_vm0, %v1809_v56, 0.0  ;;  %v57_v56 = vld [vmem:[%s8330_s1 + $0x148] sm:$0xff] }
 0xc1a   :  { %v1811_v63 = vrot.slane %v1810_v58, 4 }
 0xc1c   :  { %v1812_v0 = vadd.f32 %v1811_v63, %v1810_v58  ;;  %v58_v58 = vld [vmem:[%s8330_s1 + $0x150] sm:$0xff]  ;;  %v59_v63 = vld [vmem:[%s8330_s1 + $0x158] sm:$0xff] }
 0xc1e   :  { %v1813_v1 = vrot.slane %v1812_v0, 2 }
 0xc20   :  { %v1814_v2 = vadd.f32 %v1813_v1, %v1812_v0  ;;  %v62_v1 = vld [vmem:[%s8330_s1 + $0x170] sm:$0xff] }
 0xc22   :  { %v1815_v43 = vrot.slane %v1814_v2, 1 }
 0xc24   :  { %v1816_v6 = vadd.f32 %v1815_v43, %v1814_v2  ;;  %v63_v43 = vld [vmem:[%s8330_s1 + $0x178] sm:$0xff] }
 0xc26   :  { %v1817_v9 = vmul.f32 %v1816_v6, %v7305_v7  ;;  %v64_v6 = vld [vmem:[%s8330_s1 + $0x180] sm:$0xff] }
 0xc28   :  { %6433 = vmatmul.mubr.msk.f32.vlgmr.msra.gmra.mrb[18].mxu1 %vm78_vm0, %v1817_v9  ;;  %v6943_v9 = vpack.c.bf16 %v64_v6, %v63_v43 }
 0xc29   :  { %6447 = vmatprep.mubr.msk.f32.mxu1 %vm7258_vm1, %v7257_v8 }
 0xcfb   :  { %v1887_v33 = vpop.f32.mrb[18].mxu1 }
 0xcfc   :  { %v6434_v10 = vpop.f32.mrb[19].mxu1  ;;  %6438 = vmatmul.mubr.msk.f32.vlgmr.msra.gmra.mrb[24].mxu0 %vm460_vm3, %v1887_v33 }
 0xcfd   :  { %6441 = vmatpush3.msra.mxu0 %v1804_v52  ;;  %6442 = vmatprep.mubr.msk.f32.mxu0 %vm7258_vm1, %v7257_v8 }
 0xcfe   :  { %6450 = vmatprep.subr.mxu0 %v7257_v8 }
 0xd00   :  { %6443 = vmatmul.mubr.msk.f32.vlgmr.msra.gmra.mrb[26].mxu0 %vm386_vm2, %v7410_v39 }
 0xd01   :  { %6452 = vmatprep.mubr.msk.f32.mxu0 %vm7258_vm1, %v7257_v8 }
 0xdcf   :  { %v1960_v55 = vpop.f32.mrb[24].mxu0 }
 0xdd0   :  { %v6439_v11 = vpop.f32.mrb[25].mxu0 }
 0xdd1   :  { %v18_v11 = vld [vmem:[%s8330_s1 + $0x20] sm:$0xff] }
 0xdd3   :  { %v2033_v44 = vpop.f32.mrb[26].mxu0 }
 0xdd4   :  { %v6444_v12 = vpop.f32.mrb[27].mxu0  ;;  %6446 = vmatpush3.xpose.msk.msra.mxu1 %vm386_vm2, %v2033_v44 }
 0xdd5   :  { %6455 = vmatprep.subr.mxu1 %v7257_v8  ;;  %v20_v12 = vld [vmem:[%s8330_s1 + $0x30] sm:$0xff] }
 0xdd7   :  { %6448 = vmatmul.mubr.msk.f32.vlgmr.msra.gmra.mrb[20].mxu1 %vm386_vm2, %v1960_v55 }
 0xdd8   :  { %6456 = vmatpush3.msra.mxu1 %v2276_v41  ;;  %6457 = vmatprep.mubr.msk.f32.mxu1 %vm7258_vm1, %v7257_v8 }
 0xdd9   :  { %6460 = vmatprep.subr.mxu1 %v7257_v8 }
 0xeaa   :  { %v2109_v39 = vpop.f32.mrb[20].mxu1 }
 0xeab   :  { %v2110_v13 = vadd.f32 %v2109_v39, %v7514_v40  ;;  %v6449_v14 = vpop.f32.mrb[21].mxu1  ;;  %v68_v40 = vld [vmem:[%s8330_s1 + $0x1a0] sm:$0xff]  ;;  %v21_v39 = vld [vmem:[%s8330_s1 + $0x38] sm:$0xff] }
 0xeac   :  { %v6927_v4 = vpack.c.bf16 %v68_v40, %v67_v24  ;;  %v7729_v24 = vpack.c.bf16 %v24_v47, %v23_v23  ;;  %v7738_v40 = vld [vmem:[%s8330_s1 + $0x1a8] sm:$0x7] }
 0xead   :  { %v5935_v17 = vmul.f32 -1.442695, %v2110_v13  ;;  %v22_v13 = vld [vmem:[%s8330_s1 + $0x40] sm:$0xff] }
 0xeae   :  { %v7712_v14 = vpack.c.bf16 %v22_v13, %v21_v39 }
 0xeaf   :  { %7206 = vpow2.f32 %v5935_v17 }
 0xeb9   :  { %v7207_v19 = vpop.eup %7206 }
 0xeba   :  { %v2116_v22 = vadd.f32 1.0, %v7207_v19 }
 0xebc   :  { %7208 = vrcp.f32 %v2116_v22 }
 0xec6   :  { %v7209_v26 = vpop.eup %7208 }
 0xec7   :  { %6451 = vmatpush3.msra.mxu0 %v7209_v26 }
 0xec8   :  { %6453 = vmatmul.mubr.msk.f32.vlgmr.msra.gmra.mrb[28].mxu0 %vm386_vm2, %v7520_v21  ;;  %6924 = vmatprep.subr.bf16.mxu0 %v6923_v25 }
 0xec9   :  { %6926 = vmatpush3.bf16.msra.mxu0 %v6923_v25  ;;  %6478 = vmatprep.mubr.msk.f32.mxu0 %vm78_vm0, %v7296_v5  ;;  %v2693_v25 = vrot.slane %v7738_v40, %v7427_v49 }
 0xeca   :  { %6928 = vmatprep.subr.bf16.mxu0 %v6927_v4 }
 0xecd   :  { %6930 = vmatpush3.bf16.msra.mxu0 %v6927_v4 }
 0xed0   :  { %6479 = vmatmul.mubr.msk.f32.vlgmr.msra.gmra.mrb[30].mxu0 %vm78_vm0, %v7305_v7 }
 0xed1   :  { %6497 = vmatprep.mubr.msk.f32.mxu0 %vm2608_vm6, %v2531_v27 }
 0xf9b   :  { %v2185_v28 = vpop.f32.mrb[28].mxu0 }
 0xf9c   :  { %v2189_v29 = vsel %vm386_vm2, %v2185_v28, -inf  ;;  %v6454_v59 = vpop.f32.mrb[29].mxu0 }
 0xf9d   :  { %v2190_v21 = vrot.slane %v2189_v29, 4 }
 0xf9f   :  { %v2191_v15 = vmax.f32 %v2189_v29, %v2190_v21 }
 0xfa1   :  { %v2192_v16 = vrot.slane %v2191_v15, 2 }
 0xfa3   :  { %v2193_v18 = vmax.f32 %v2191_v15, %v2192_v16  ;;  %v2890_v16 = vld [vmem:[%s8330_s1 + $0x1c0] sm:$0xff] }
 0xfa5   :  { %v2194_v30 = vrot.slane %v2193_v18, 1 }
 0xfa7   :  { %v2195_v5 = vmax.f32 %v2193_v18, %v2194_v30  ;;  %v2891_v18 = vld [vmem:[%s8330_s1 + $0x1c8] sm:$0xff] }
 0xfa8   :  { %v2911_v30 = vld [vmem:[%s8330_s1 + $0x268] sm:$0xff] }
 0xfa9   :  { %v2196_v31 = vsub.f32 %v2185_v28, %v2195_v5  ;;  %v6979_v5 = vpack.c.bf16 %v2891_v18, %v2890_v16  ;;  %v2943_v16 = vld [vmem:[%s8332_s2 + $0x68] sm:$0xff]  ;;  %v2945_v18 = vld [vmem:[%s8332_s2 + $0x78] sm:$0xff] }
 0xfab   :  { %v2197_v60 = vmul.f32 1.442695, %v2196_v31  ;;  %v2912_v31 = vld [vmem:[%s8330_s1 + $0x270] sm:$0xff] }
 0xfad   :  { %7210 = vpow2.f32 %v2197_v60  ;;  %v6995_v60 = vpack.c.bf16 %v2912_v31, %v2911_v30  ;;  %v2888_v30 = vld [vmem:[%s8330_s1 + $0x1b0] sm:$0x3]  ;;  %v7018_v31 = vpack.c.bf16 %v2945_v18, %v2943_v16 }
 0xfb7   :  { %v7211_v32 = vpop.eup %7210 }
 0xfb8   :  { %v2199_v61 = vsel %vm386_vm2, %v7211_v32, 0.0 }
 0xfb9   :  { %v2200_v34 = vrot.slane %v2199_v61, 4 }
 0xfbb   :  { %v2201_v7 = vadd.f32 %v2200_v34, %v2199_v61  ;;  %v2893_v61 = vld [vmem:[%s8330_s1 + $0x1d8] sm:$0xff] }
 0xfbc   :  { %v2913_v34 = vld [vmem:[%s8330_s1 + $0x278] sm:$0xff] }
 0xfbd   :  { %v2202_v35 = vrot.slane %v2201_v7, 2 }
 0xfbf   :  { %v2203_v36 = vadd.f32 %v2202_v35, %v2201_v7  ;;  %v2914_v35 = vld [vmem:[%s8330_s1 + $0x280] sm:$0xff] }
 0xfc1   :  { %v2204_v42 = vrot.slane %v2203_v36, 1 }
 0xfc3   :  { %v2205_v50 = vadd.f32 %v2204_v42, %v2203_v36  ;;  %v6999_v36 = vpack.c.bf16 %v2914_v35, %v2913_v34  ;;  %v2894_v42 = vld [vmem:[%s8330_s1 + $0x1e0] sm:$0xff]  ;;  %v2949_v34 = vld [vmem:[%s8332_s2 + $0x98] sm:$0xff] }
 0xfc5   :  { %7212 = vrcp.f32 %v2205_v50  ;;  %v2895_v50 = vld [vmem:[%s8330_s1 + $0x1e8] sm:$0xff] }
 0xfcf   :  { %v7213_v51 = vpop.eup %7212 }
 0xfd0   :  { %v2207_v52 = vmul.f32 %v7213_v51, %v7211_v32  ;;  %v2892_v32 = vld [vmem:[%s8330_s1 + $0x1d0] sm:$0xff]  ;;  %v2915_v51 = vld [vmem:[%s8330_s1 + $0x288] sm:$0xff] }
 0xfd1   :  { %v6983_v7 = vpack.c.bf16 %v2893_v61, %v2892_v32  ;;  %v2944_v32 = vld [vmem:[%s8332_s2 + $0x70] sm:$0xff]  ;;  %v2947_v61 = vld [vmem:[%s8332_s2 + $0x88] sm:$0xff] }
 0xfd2   :  { %v2241_v37 = vmul.f32 %v2207_v52, %v7548_v38  ;;  %v2208_v53 = vmul.f32 %v2207_v52, %v7554_v57  ;;  %v2424_v54 = vmul.f32 %v2207_v52, %v7560_v62  ;;  %v6931_v38 = vpack.c.bf16 %v58_v58, %v57_v56  ;;  %v60_v57 = vld [vmem:[%s8330_s1 + $0x160] sm:$0xff]  ;;  %v61_v62 = vld [vmem:[%s8330_s1 + $0x168] sm:$0xff]  ;;  %v2897_v56 = vld [vmem:[%s8330_s1 + $0x1f8] sm:$0xff] }
 0xfd3   :  { %v6935_v0 = vpack.c.bf16 %v60_v57, %v59_v63  ;;  %v6939_v2 = vpack.c.bf16 %v62_v1, %v61_v62  ;;  %v6987_v52 = vpack.c.bf16 %v2895_v50, %v2894_v42  ;;  %v2917_v58 = vld [vmem:[%s8330_s1 + $0x298] sm:$0xff]  ;;  %v7022_v35 = vpack.c.bf16 %v2949_v34, %v2947_v61  ;;  %v2948_v42 = vld [vmem:[%s8332_s2 + $0x90] sm:$0xff]  ;;  %v2951_v50 = vld [vmem:[%s8332_s2 + $0xa8] sm:$0xff] }
 0xfd4   :  { %2242 = vxpose.xlu0.b32.start.end [1/1] (short) (narrow) %v2241_v37, 8  ;;  %2209 = vxpose.xlu1.b32.start.end [1/1] (short) (narrow) %v2208_v53, 8  ;;  %v2916_v37 = vld [vmem:[%s8330_s1 + $0x290] sm:$0xff]  ;;  %v8019_v34 = vld [vmem:[%s8330_s1 + $0x208] sm:$0xff] }
 0xfd5   :  { %6932 = vmatprep.subr.bf16.mxu0 %v6931_v38  ;;  %v7003_v53 = vpack.c.bf16 %v2916_v37, %v2915_v51  ;;  %v2953_v51 = vld [vmem:[%s8332_s2 + $0xb8] sm:$0xff] }
 0xfd6   :  { %6934 = vmatpush3.bf16.msra.mxu0 %v6931_v38  ;;  %v2918_v38 = vld [vmem:[%s8330_s1 + $0x2a0] sm:$0xff]  ;;  %v7026_v37 = vpack.c.bf16 %v2953_v51, %v2951_v50 }
 0xfd7   :  { %6936 = vmatprep.subr.bf16.mxu0 %v6935_v0  ;;  %v7007_v57 = vpack.c.bf16 %v2918_v38, %v2917_v58  ;;  %v7900_v38 = vld [vmem:[%s8330_s1 + $0x1b8] sm:$0xff] }
 0xfd8   :  { %2425 = vxpose.xlu0.b32.start.end [1/1] (short) (narrow) %v2424_v54, 8  ;;  %v2896_v54 = vld [vmem:[%s8330_s1 + $0x1f0] sm:$0xff] }
 0xfd9   :  { %v6991_v63 = vpack.c.bf16 %v2897_v56, %v2896_v54  ;;  %v2952_v54 = vld [vmem:[%s8332_s2 + $0xb0] sm:$0xff] }
 0xfda   :  { %6938 = vmatpush3.bf16.msra.mxu0 %v6935_v0 }
 0xfdb   :  { %6940 = vmatprep.subr.bf16.mxu0 %v6939_v2 }
 0xfde   :  { %6942 = vmatpush3.bf16.msra.mxu0 %v6939_v2 }
 0xfdf   :  { %6944 = vmatprep.subr.bf16.mxu0 %v6943_v9 }
 0xfe2   :  { %6946 = vmatpush3.bf16.msra.mxu0 %v6943_v9 }
0x1054   :  { %v2258_v33 = vpop.trf.xlu0  ;;  %v2225_v10 = vpop.trf.xlu1 }
0x1055   :  { %6458 = vmatmul.mubr.msk.f32.vlgmr.msra.gmra.mrb[22].mxu1 %vm386_vm2, %v2258_v33 }
0x1056   :  { %6461 = vmatpush3.msra.mxu1 %v7420_v45  ;;  %6462 = vmatprep.mubr.msk.f32.mxu1 %vm7258_vm1, %v7257_v8  ;;  %v17_v45 = vld [vmem:[%s8330_s1 + $0x18] sm:$0xff] }
0x1057   :  { %6465 = vmatprep.subr.mxu1 %v7257_v8  ;;  %v7692_v44 = vpack.c.bf16 %v18_v11, %v17_v45 }
0x1058   :  { %v2441_v55 = vpop.trf.xlu0 }
0x1059   :  { %6964 = vmatprep.subr.bf16.mxu0 %v7692_v44 }
0x105d   :  { %6463 = vmatmul.mubr.msk.f32.vlgmr.msra.gmra.mrb[22].mxu1 %vm386_vm2, %v2225_v10 }
0x105e   :  { %6466 = vmatpush3.msra.mxu1 %v7422_v46  ;;  %6467 = vmatprep.mubr.msk.f32.mxu1 %vm7258_vm1, %v7257_v8  ;;  %v19_v46 = vld [vmem:[%s8330_s1 + $0x28] sm:$0xff] }
0x105f   :  { %v7700_v41 = vpack.c.bf16 %v20_v12, %v19_v46  ;;  %6948 = vmatprep.subr.bf16.mxu1 %v7692_v44  ;;  %v2884_v46 = vsub.s32 2, %v7424_v48  ;;  %v2879_v12 = vrot.slane %v7738_v40, %v7574_v3 }
0x1065   :  { %6468 = vmatmul.mubr.msk.f32.vlgmr.msra.gmra.mrb[22].mxu1 %vm386_vm2, %v2441_v55 }
0x1066   :  { %6950 = vmatpush3.bf16.msra.mxu1 %v7692_v44 }
0x1067   :  { %6952 = vmatprep.subr.bf16.mxu1 %v7700_v41 }
0x106a   :  { %6954 = vmatpush3.bf16.msra.mxu1 %v7700_v41 }
0x106b   :  { %6956 = vmatprep.subr.bf16.mxu1 %v7712_v14 }
0x106e   :  { %6958 = vmatpush3.bf16.msra.mxu1 %v7712_v14 }
0x106f   :  { %6960 = vmatprep.subr.bf16.mxu1 %v7729_v24 }
0x1072   :  { %6962 = vmatpush3.bf16.msra.mxu1 %v7729_v24 }
0x1073   :  { %6980 = vmatprep.subr.bf16.mxu1 %v6979_v5 }
0x1138   :  { %v2526_v17 = vpop.f32.mrb[22].mxu1 }
0x1139   :  { %v2532_v19 = vmax.f32 %v2526_v17, 0.0  ;;  %v6469_v22 = vpop.f32.mrb[23].mxu1 }
0x113a   :  { %v2885_v22 = vrot.slane %v7738_v40, %v2884_v46  ;;  %v2938_v40 = vld [vmem:[%s8332_s2 + $0x40] sm:$0xff] }
0x113b   :  { %6498 = vmatmul.mubr.msk.f32.vlgmr.msra.gmra.mrb[30].mxu0 %vm2608_vm6, %v2532_v19 }
0x113c   :  { %6966 = vmatpush3.bf16.msra.mxu0 %v7692_v44 }
0x113d   :  { %6968 = vmatprep.subr.bf16.mxu0 %v7700_v41 }
0x1140   :  { %6970 = vmatpush3.bf16.msra.mxu0 %v7700_v41 }
0x1141   :  { %6972 = vmatprep.subr.bf16.mxu0 %v7712_v14 }
0x1144   :  { %6974 = vmatpush3.bf16.msra.mxu0 %v7712_v14 }
0x1145   :  { %6976 = vmatprep.subr.bf16.mxu0 %v7729_v24 }
0x1148   :  { %6978 = vmatpush3.bf16.msra.mxu0 %v7729_v24 }
0x1149   :  { %6996 = vmatprep.subr.bf16.mxu0 %v6995_v60 }
0x120e   :  { %v6499_v26 = vpop.f32.mrb[30].mxu0 }
0x120f   :  { %v2695_v4 = vadd.f32 %v6499_v26, %v2693_v25  ;;  %v2681_v27 = vpop.f32.mrb[31].mxu0 }
0x1210   :  { %v2694_v28 = vadd.f32 %v2693_v25, %v2681_v27  ;;  %v2941_v27 = vld [vmem:[%s8332_s2 + $0x58] sm:$0xff] }
0x1211   :  { %v7742_v29 = vmax.f32 %v2695_v4, 0.0  ;;  %v2939_v4 = vld [vmem:[%s8332_s2 + $0x48] sm:$0xff] }
0x1212   :  { %v7744_v59 = vmax.f32 %v2694_v28, 0.0 }
0x1213   :  { %v2780_v15 = vmul.f32 %v7742_v29, %v7742_v29 }
0x1214   :  { %v2779_v21 = vmul.f32 %v7744_v59, %v7744_v59  ;;  %6516 = vmatprep.mubr.msk.f32.mxu1 %vm2608_vm6, %v7744_v59 }
0x1215   :  { %6517 = vmatmul.mubr.msk.f32.vlgmr.msra.gmra.mrb[24].mxu1 %vm2608_vm6, %v7742_v29 }
0x1216   :  { %6535 = vmatprep.mubr.msk.f32.mxu0 %vm2608_vm6, %v2779_v21  ;;  %6982 = vmatpush3.bf16.msra.mxu1 %v6979_v5  ;;  %v2940_v21 = vld [vmem:[%s8332_s2 + $0x50] sm:$0xff] }
0x1217   :  { %6536 = vmatmul.mubr.msk.f32.vlgmr.msra.gmra.mrb[32].mxu0 %vm2608_vm6, %v2780_v15  ;;  %6984 = vmatprep.subr.bf16.mxu1 %v6983_v7  ;;  %v7016_v5 = vpack.c.bf16 %v2940_v21, %v2938_v40 }
0x1218   :  { %6998 = vmatpush3.bf16.msra.mxu0 %v6995_v60  ;;  %v2942_v60 = vld [vmem:[%s8332_s2 + $0x60] sm:$0xff] }
0x1219   :  { %7000 = vmatprep.subr.bf16.mxu0 %v6999_v36 }
0x121a   :  { %6986 = vmatpush3.bf16.msra.mxu1 %v6983_v7  ;;  %v7020_v7 = vpack.c.bf16 %v2944_v32, %v2942_v60 }
0x121b   :  { %6988 = vmatprep.subr.bf16.mxu1 %v6987_v52 }
0x121c   :  { %7002 = vmatpush3.bf16.msra.mxu0 %v6999_v36  ;;  %v2946_v36 = vld [vmem:[%s8332_s2 + $0x80] sm:$0xff] }
0x121d   :  { %7004 = vmatprep.subr.bf16.mxu0 %v7003_v53 }
0x121e   :  { %6990 = vmatpush3.bf16.msra.mxu1 %v6987_v52  ;;  %v7024_v52 = vpack.c.bf16 %v2948_v42, %v2946_v36 }
0x121f   :  { %6992 = vmatprep.subr.bf16.mxu1 %v6991_v63 }
0x1220   :  { %7006 = vmatpush3.bf16.msra.mxu0 %v7003_v53  ;;  %v2950_v53 = vld [vmem:[%s8332_s2 + $0xa0] sm:$0xff] }
0x1221   :  { %7008 = vmatprep.subr.bf16.mxu0 %v7007_v57  ;;  %v7028_v56 = vpack.c.bf16 %v2952_v54, %v2950_v53 }
0x1222   :  { %6994 = vmatpush3.bf16.msra.mxu1 %v6991_v63 }
0x1223   :  { %7011 = vmatprep.subr.bf16.mxu1 %v7259_v20 }
0x1224   :  { %7010 = vmatpush3.bf16.msra.mxu0 %v7007_v57 }
0x1225   :  { %6583 = vmatprep.subr.mxu0 %v7257_v8 }
0x12e8   :  { %v6518_v0 = vpop.f32.mrb[24].mxu1 }
0x12e9   :  { %v2863_v62 = vmul.f32 %v6518_v0, %v6518_v0  ;;  %v2770_v1 = vpop.f32.mrb[25].mxu1  ;;  %v2869_v39 = vsub.f32 %v7742_v29, %v6518_v0 }
0x12ea   :  { %v2862_v2 = vmul.f32 %v2770_v1, %v2770_v1  ;;  %v6537_v43 = vpop.f32.mrb[32].mxu0  ;;  %v2868_v17 = vsub.f32 %v7744_v59, %v2770_v1  ;;  %v7014_v59 = vpack.c.bf16 %v2941_v27, %v2939_v4 }
0x12eb   :  { %v2865_v6 = vsub.f32 %v6537_v43, %v2863_v62  ;;  %v2853_v9 = vpop.f32.mrb[33].mxu0 }
0x12ec   :  { %v2864_v33 = vsub.f32 %v2853_v9, %v2862_v2 }
0x12ed   :  { %v2867_v10 = vmax.f32 %v2865_v6, 0.0 }
0x12ee   :  { %v2866_v55 = vmax.f32 %v2864_v33, 0.0  ;;  %v7921_v33 = vld [vmem:[%s8330_s1 + $0x220] sm:$0xff] }
0x12ef   :  { %v2871_v45 = vadd.f32 1e-05, %v2867_v10 }
0x12f0   :  { %v2870_v11 = vadd.f32 1e-05, %v2866_v55  ;;  %v7928_v55 = vld [vmem:[%s8330_s1 + $0x228] sm:$0xff] }
0x12f1   :  { %7214 = vrsqrt.f32 %v2871_v45 }
0x12f2   :  { %7216 = vrsqrt.f32 %v2870_v11  ;;  %v7933_v11 = vld [vmem:[%s8330_s1 + $0x230] sm:$0xff] }
0x12fb   :  { %v7215_v13 = vpop.eup %7214 }
0x12fc   :  { %v7217_v19 = vpop.eup %7216  ;;  %v2875_v23 = vmul.f32 %v7215_v13, %v2869_v39  ;;  %v7948_v39 = vld [vmem:[%s8330_s1 + $0x240] sm:$0xff]  ;;  %v7957_v13 = vld [vmem:[%s8330_s1 + $0x248] sm:$0xff] }
0x12fd   :  { %v2874_v47 = vmul.f32 %v7217_v19, %v2868_v17  ;;  %v7962_v17 = vld [vmem:[%s8330_s1 + $0x250] sm:$0xff]  ;;  %v7971_v19 = vld [vmem:[%s8330_s1 + $0x258] sm:$0xff]  ;;  %v8004_v32 = vpack.c.bf16 %v7957_v13, %v7948_v39 }
0x12fe   :  { %v2881_v25 = vmul.f32 %v2879_v12, %v2875_v23  ;;  %v8010_v61 = vpack.c.bf16 %v7971_v19, %v7962_v17 }
0x12ff   :  { %v2880_v26 = vmul.f32 %v2879_v12, %v2874_v47  ;;  %v7943_v12 = vld [vmem:[%s8330_s1 + $0x238] sm:$0xff] }
0x1300   :  { %v7820_v28 = vadd.f32 %v2885_v22, %v2881_v25  ;;  %v7996_v60 = vpack.c.bf16 %v7943_v12, %v7933_v11 }
0x1301   :  { %v7822_v29 = vadd.f32 %v2885_v22, %v2880_v26 }
0x1303   :  { %6554 = vmatprep.mubr.msk.f32.mxu1 %vm2608_vm6, %v7822_v29  ;;  %6573 = vmatprep.mubr.msk.f32.mxu0 %vm2608_vm6, %v7822_v29  ;;  %v7012_v15 = vpack.c.bf16 %v7820_v28, %v7822_v29 }
0x1304   :  { %6555 = vmatmul.mubr.msk.f32.vlgmr.msra.gmra.mrb[26].mxu1 %vm2608_vm6, %v7820_v28  ;;  %6574 = vmatmul.mubr.msk.f32.vlgmr.msra.gmra.mrb[34].mxu0 %vm2608_vm6, %v7820_v28 }
0x1305   :  { %7013 = vmatpush3.bf16.msra.mxu1 %v7012_v15  ;;  %6580 = vmatprep.mubr.msk.f32.mxu1 %vm7258_vm1, %v7257_v8  ;;  %v7984_v15 = vld [vmem:[%s8330_s1 + $0x218] sm:$0xff] }
0x1306   :  { %7015 = vmatprep.subr.bf16.mxu1 %v7014_v59  ;;  %6585 = vmatprep.mubr.msk.f32.mxu0 %vm7258_vm1, %v7257_v8 }
0x1308   :  { %6581 = vmatmul.mubr.msk.f32.vlgmr.msra.gmra.mrb[28].mxu1 %vm235_vm4, %v2888_v30 }
0x1309   :  { %7017 = vmatpush1.bf16.msra.mxu1 %v7016_v5  ;;  %3247 = vmatprep.mubr.f32.mxu1 %v7257_v8 }
0x130a   :  { %7019 = vmatprep.subr.bf16.mxu1 %v7018_v31  ;;  %v7990_v31 = vpack.c.bf16 %v7928_v55, %v7921_v33 }
0x130d   :  { %7021 = vmatpush1.bf16.msra.mxu1 %v7020_v7 }
0x130e   :  { %7023 = vmatprep.subr.bf16.mxu1 %v7022_v35 }
0x1311   :  { %7025 = vmatpush1.bf16.msra.mxu1 %v7024_v52  ;;  %v8025_v52 = vld [vmem:[%s8330_s1 + $0x200] sm:$0xff] }
0x1312   :  { %7027 = vmatprep.subr.bf16.mxu1 %v7026_v37 }
0x1315   :  { %7029 = vmatpush1.bf16.msra.mxu1 %v7028_v56 }
0x1316   :  { %7030 = vmatprep.subr.bf16.mxu1 %v7259_v20 }
0x1318   :  { %5953 = vmatmul.mubr.msk.f32.vlgmr.msra.gmra.mrb[30].mxu1 %vm2608_vm6, %v7822_v29 }
0x1319   :  { %3253 = vmatprep.mubr.f32.mxu1 %v7257_v8 }
0x131c   :  { %5954 = vmatmul.mubr.msk.f32.gmra.mrb[32].mxu1 %vm2608_vm6, %v7820_v28 }
0x131d   :  { %6618 = vmatprep.mubr.msk.f32.mxu1 %vm7258_vm1, %v7257_v8 }
0x13d7   :  { %v7893_v58 = vpop.f32.mrb[26].mxu1  ;;  %v7895_v63 = vpop.f32.mrb[34].mxu0 }
0x13d8   :  { %v3026_v57 = vpop.f32.mrb[27].mxu1  ;;  %v7902_v0 = vpop.f32.mrb[35].mxu0 }
0x13d9   :  { %6584 = vmatpush3.msra.mxu0 %v3026_v57 }
0x13da   :  { %6586 = vmatmul.mubr.msk.f32.vlgmr.msra.gmra.mrb[36].mxu0 %vm386_vm2, %v7900_v38 }
0x13db   :  { %v7906_v62 = vpop.f32.mrb[28].mxu1  ;;  %6590 = vmatprep.mubr.msk.f32.mxu0 %vm386_vm2, %v7921_v33 }
0x13dc   :  { %v6582_v1 = vpop.f32.mrb[29].mxu1  ;;  %v3465_v21 = vrot.slane %v7906_v62, %v7427_v49 }
0x13de   :  { %v3466_v5 = vmul.f32 %v3465_v21, %v7984_v15 }
0x13eb   :  { %v7908_v2 = vpop.f32.mrb[30].mxu1 }
0x13ec   :  { %4115 = vrot.lane.b32.xlu1 %v7908_v2, %s7260_s12  ;;  %v7912_v43 = vpop.f32.mrb[31].mxu1 }
0x13ef   :  { %v7914_v6 = vpop.f32.mrb[32].mxu1 }
0x13f0   :  { %v7916_v9 = vpop.f32.mrb[33].mxu1 }
0x14ad   :  { %v3329_v10 = vpop.f32.mrb[36].mxu0 }
0x14ae   :  { %v6587_v45 = vpop.f32.mrb[37].mxu0  ;;  %6588 = vmatprep.subr.mxu0 %v3329_v10 }
0x14af   :  { %6589 = vmatpush3.msra.mxu0 %v3329_v10 }
0x14b0   :  { %6591 = vmatmul.mubr.msk.f32.vlgmr.msra.gmra.mrb[38].mxu0 %vm386_vm2, %v7928_v55  ;;  %6621 = vmatprep.subr.mxu0 %v7257_v8 }
0x14b1   :  { %6593 = vmatprep.mubr.msk.f32.mxu0 %vm386_vm2, %v7933_v11 }
0x14b4   :  { %6594 = vmatmul.mubr.msk.f32.gmra.mrb[40].mxu0 %vm386_vm2, %v7943_v12 }
0x14b5   :  { %6596 = vmatprep.mubr.msk.f32.mxu0 %vm386_vm2, %v7948_v39 }
0x14b8   :  { %6597 = vmatmul.mubr.msk.f32.gmra.mrb[42].mxu0 %vm386_vm2, %v7957_v13 }
0x14b9   :  { %6599 = vmatprep.mubr.msk.f32.mxu0 %vm386_vm2, %v7962_v17 }
0x14bc   :  { %6600 = vmatmul.mubr.msk.f32.gmra.mrb[44].mxu0 %vm386_vm2, %v7971_v19 }
0x14bd   :  { %6623 = vmatprep.mubr.msk.f32.mxu0 %vm7258_vm1, %v7257_v8 }
0x1583   :  { %v6592_v22 = vpop.f32.mrb[38].mxu0 }
0x1584   :  { %v3423_v23 = vpop.f32.mrb[39].mxu0 }
0x1585   :  { %v7031_v47 = vpack.c.bf16 %v6592_v22, %v3423_v23 }
0x1587   :  { %v6595_v25 = vpop.f32.mrb[40].mxu0  ;;  %7032 = vmatpush3.bf16.msra.mxu1 %v7031_v47 }
0x1588   :  { %v3433_v26 = vpop.f32.mrb[41].mxu0  ;;  %7033 = vmatprep.subr.bf16.mxu1 %v7259_v20 }
0x1589   :  { %v7034_v4 = vpack.c.bf16 %v6595_v25, %v3433_v26 }
0x158b   :  { %v6598_v27 = vpop.f32.mrb[42].mxu0  ;;  %7035 = vmatpush3.bf16.msra.mxu1 %v7034_v4 }
0x158c   :  { %v3443_v59 = vpop.f32.mrb[43].mxu0  ;;  %7036 = vmatprep.subr.bf16.mxu1 %v7259_v20 }
0x158d   :  { %v7037_v40 = vpack.c.bf16 %v6598_v27, %v3443_v59 }
0x158f   :  { %v6601_v16 = vpop.f32.mrb[44].mxu0  ;;  %7038 = vmatpush3.bf16.msra.mxu1 %v7037_v40 }
0x1590   :  { %v3453_v18 = vpop.f32.mrb[45].mxu0  ;;  %7039 = vmatprep.subr.bf16.mxu1 %v7259_v20 }
0x1591   :  { %v7040_v30 = vpack.c.bf16 %v6601_v16, %v3453_v18 }
0x1593   :  { %7041 = vmatpush3.bf16.msra.mxu1 %v7040_v30 }
0x1594   :  { %7042 = vmatprep.subr.bf16.mxu1 %v7259_v20 }
0x1596   :  { %6619 = vmatmul.mubr.msk.f32.vlgmr.msra.gmra.mrb[34].mxu1 %vm2608_vm6, %v3466_v5  ;;  %v8037_v5 = vld [vmem:[%s8330_s1 + $0x210] ss:$0 sm:$0xff] }
0x1597   :  { %7044 = vmatpush3.bf16.msra.mxu1 %v7990_v31  ;;  %6642 = vmatprep.mubr.msk.f32.mxu1 %vm7258_vm1, %v7257_v8 }
0x1598   :  { %7045 = vmatprep.subr.bf16.mxu1 %v7259_v20 }
0x159b   :  { %7047 = vmatpush3.bf16.msra.mxu1 %v7996_v60 }
0x159c   :  { %7048 = vmatprep.subr.bf16.mxu1 %v7259_v20 }
0x159f   :  { %7050 = vmatpush3.bf16.msra.mxu1 %v8004_v32 }
0x15a0   :  { %7051 = vmatprep.subr.bf16.mxu1 %v7259_v20 }
0x15a3   :  { %7053 = vmatpush3.bf16.msra.mxu1 %v8010_v61 }
0x15a4   :  { %6665 = vmatprep.subr.mxu1 %v7257_v8 }
0x1669   :  { %v3536_v7 = vpop.f32.mrb[34].mxu1 }
0x166a   :  { %v3537_v35 = vadd.f32 %v3536_v7, %v8019_v34  ;;  %v6620_v36 = vpop.f32.mrb[35].mxu1 }
0x166c   :  { %v5965_v42 = vmul.f32 -1.442695, %v3537_v35 }
0x166e   :  { %7218 = vpow2.f32 %v5965_v42  ;;  %v8044_v42 = vld [vmem:[%s8330_s1 + $0x260] sm:$0xff] }
0x1678   :  { %v7219_v50 = vpop.eup %7218 }
0x1679   :  { %v3543_v51 = vadd.f32 1.0, %v7219_v50 }
0x167b   :  { %7220 = vrcp.f32 %v3543_v51 }
0x1685   :  { %v7221_v37 = vpop.eup %7220 }
0x1686   :  { %6622 = vmatpush3.msra.mxu0 %v7221_v37 }
0x1687   :  { %6624 = vmatmul.mubr.msk.f32.vlgmr.msra.gmra.mrb[46].mxu0 %vm386_vm2, %v8025_v52  ;;  %6645 = vmatprep.subr.mxu0 %v7257_v8 }
0x1688   :  { %6647 = vmatprep.mubr.msk.f32.mxu0 %vm7258_vm1, %v7257_v8  ;;  %6646 = vmatpush3.msra.mxu0 %v8044_v42 }
0x1689   :  { %6650 = vmatprep.subr.mxu0 %v7257_v8 }
0x175a   :  { %v3615_v53 = vpop.f32.mrb[46].mxu0 }
0x175b   :  { %v3619_v54 = vsel %vm386_vm2, %v3615_v53, -inf  ;;  %v6625_v56 = vpop.f32.mrb[47].mxu0 }
0x175c   :  { %v3620_v57 = vrot.slane %v3619_v54, 4 }
0x175e   :  { %v3621_v1 = vmax.f32 %v3619_v54, %v3620_v57 }
0x1760   :  { %v3622_v10 = vrot.slane %v3621_v1, 2 }
0x1762   :  { %v3623_v45 = vmax.f32 %v3621_v1, %v3622_v10 }
0x1764   :  { %v3624_v22 = vrot.slane %v3623_v45, 1 }
0x1766   :  { %v3625_v23 = vmax.f32 %v3623_v45, %v3624_v22  ;;  %v4116_v22 = vpop.permute.xlu1 %4115 }
0x1768   :  { %v3626_v47 = vsub.f32 %v3615_v53, %v3625_v23 }
0x176a   :  { %v3627_v25 = vmul.f32 1.442695, %v3626_v47 }
0x176c   :  { %7222 = vpow2.f32 %v3627_v25 }
0x1776   :  { %v7223_v26 = vpop.eup %7222 }
0x1777   :  { %v3629_v4 = vsel %vm386_vm2, %v7223_v26, 0.0 }
0x1778   :  { %v3630_v27 = vrot.slane %v3629_v4, 4 }
0x177a   :  { %v3631_v59 = vadd.f32 %v3630_v27, %v3629_v4 }
0x177c   :  { %v3632_v40 = vrot.slane %v3631_v59, 2 }
0x177e   :  { %v3633_v21 = vadd.f32 %v3632_v40, %v3631_v59 }
0x1780   :  { %v3634_v16 = vrot.slane %v3633_v21, 1 }
0x1782   :  { %v3635_v18 = vadd.f32 %v3634_v16, %v3633_v21 }
0x1784   :  { %7224 = vrcp.f32 %v3635_v18 }
0x178e   :  { %v7225_v30 = vpop.eup %7224 }
0x178f   :  { %v3637_v7 = vmul.f32 %v7225_v30, %v7223_v26 }
0x1791   :  { %v3642_v35 = vmul.f32 %v8037_v5, %v3637_v7 }
0x1793   :  { %v3643_v36 = vsel %vm386_vm2, %v3642_v35, 0.0 }
0x1794   :  { %3644 = vadd.xlane.f32.xlu0 %v3643_v36 }
0x1821   :  { %v3645_v50 = vpop.xlane.xlu0 %3644 }
0x1822   :  { %v3646_v51 = vmul.f32 %v3645_v50, %v7984_v15 }
0x1824   :  { %v3647_v37 = vsel %vm2608_vm6, %v3646_v51, 0.0 }
0x1825   :  { %v3648_v53 = vrot.slane %v3647_v37, 4 }
0x1827   :  { %v3649_v54 = vadd.f32 %v3648_v53, %v3647_v37 }
0x1829   :  { %v3650_v56 = vrot.slane %v3649_v54, 2 }
0x182b   :  { %v3651_v57 = vadd.f32 %v3650_v56, %v3649_v54 }
0x182d   :  { %v3652_v1 = vrot.slane %v3651_v57, 1 }
0x182f   :  { %v3653_v10 = vadd.f32 %v3652_v1, %v3651_v57 }
0x1831   :  { %v3654_v45 = vmul.f32 %v3653_v10, %v7822_v29 }
0x1833   :  { %6643 = vmatmul.mubr.msk.f32.vlgmr.msra.gmra.mrb[36].mxu1 %vm2608_vm6, %v3654_v45 }
0x1834   :  { %6666 = vmatpush3.msra.mxu1 %v4116_v22  ;;  %6667 = vmatprep.mubr.msk.f32.mxu1 %vm7258_vm1, %v7257_v8 }
0x1835   :  { %6670 = vmatprep.subr.mxu1 %v7257_v8 }
0x1906   :  { %v3724_v23 = vpop.f32.mrb[36].mxu1 }
0x1907   :  { %v6644_v47 = vpop.f32.mrb[37].mxu1  ;;  %6648 = vmatmul.mubr.msk.f32.vlgmr.msra.gmra.mrb[48].mxu0 %vm386_vm2, %v3724_v23 }
0x1908   :  { %6651 = vmatpush3.msra.mxu0 %v3637_v7  ;;  %6652 = vmatprep.mubr.msk.f32.mxu0 %vm7258_vm1, %v7257_v8  ;;  %v8077_v7 = vld [vmem:[%s8330_s1 + $0x2a8] sm:$0xff] }
0x1909   :  { %6655 = vmatprep.subr.mxu0 %v7257_v8 }
0x190b   :  { %6653 = vmatmul.mubr.msk.f32.vlgmr.msra.gmra.mrb[50].mxu0 %vm386_vm2, %v7902_v0  ;;  %v8071_v0 = vld [vmem:[%s8330_s1 + $0x2b0] sm:$0xff] }
0x190c   :  { %6657 = vmatprep.mubr.msk.f32.mxu0 %vm7258_vm1, %v7257_v8 }
0x19da   :  { %v3797_v25 = vpop.f32.mrb[48].mxu0 }
0x19db   :  { %v6649_v26 = vpop.f32.mrb[49].mxu0 }
0x19dc   :  { %v8117_v26 = vld [vmem:[%s8330_s1] sm:$0xff] }
0x19de   :  { %v3870_v4 = vpop.f32.mrb[50].mxu0 }
0x19df   :  { %v6654_v27 = vpop.f32.mrb[51].mxu0  ;;  %6656 = vmatpush3.xpose.msk.msra.mxu0 %vm386_vm2, %v3870_v4 }
0x19e0   :  { %6660 = vmatprep.subr.mxu0 %v7257_v8  ;;  %v8123_v27 = vld [vmem:[%s8330_s1 + $0x10] sm:$0xff] }
0x19e2   :  { %6658 = vmatmul.mubr.msk.f32.vlgmr.msra.gmra.mrb[52].mxu0 %vm386_vm2, %v3797_v25 }
0x19e3   :  { %6662 = vmatprep.mubr.msk.f32.mxu0 %vm7258_vm1, %v7257_v8 }
0x1ab5   :  { %v3946_v59 = vpop.f32.mrb[52].mxu0 }
0x1ab6   :  { %v3947_v40 = vadd.f32 %v3946_v59, %v8071_v0  ;;  %v6659_v21 = vpop.f32.mrb[53].mxu0 }
0x1ab8   :  { %v5973_v16 = vmul.f32 -1.442695, %v3947_v40 }
0x1aba   :  { %7226 = vpow2.f32 %v5973_v16 }
0x1ac4   :  { %v7227_v18 = vpop.eup %7226 }
0x1ac5   :  { %v3953_v30 = vadd.f32 1.0, %v7227_v18 }
0x1ac7   :  { %7228 = vrcp.f32 %v3953_v30 }
0x1ad1   :  { %v7229_v35 = vpop.eup %7228 }
0x1ad2   :  { %6661 = vmatpush3.msra.mxu0 %v7229_v35 }
0x1ad3   :  { %6663 = vmatmul.mubr.msk.f32.vlgmr.msra.gmra.mrb[54].mxu0 %vm386_vm2, %v8077_v7  ;;  %6680 = vmatprep.subr.mxu0 %v7257_v8 }
0x1ad4   :  { %6681 = vmatpush3.msra.mxu0 %v7893_v58  ;;  %6682 = vmatprep.mubr.msk.f32.mxu0 %vm7258_vm1, %v7257_v8 }
0x1ad7   :  { %6683 = vmatmul.mubr.msk.f32.vlgmr.msra.gmra.mrb[56].mxu0 %vm386_vm2, %v7900_v38 }
0x1ad8   :  { %6687 = vmatprep.mubr.msk.f32.mxu0 %vm386_vm2, %v7921_v33 }
0x1ba6   :  { %v4025_v36 = vpop.f32.mrb[54].mxu0 }
0x1ba7   :  { %v4029_v50 = vsel %vm386_vm2, %v4025_v36, -inf  ;;  %v6664_v51 = vpop.f32.mrb[55].mxu0 }
0x1ba8   :  { %v4030_v37 = vrot.slane %v4029_v50, 4 }
0x1baa   :  { %v4031_v53 = vmax.f32 %v4029_v50, %v4030_v37  ;;  %v4437_v54 = vpop.f32.mrb[56].mxu0 }
0x1bab   :  { %6685 = vmatprep.subr.mxu0 %v4437_v54  ;;  %v6684_v56 = vpop.f32.mrb[57].mxu0 }
0x1bac   :  { %v4032_v57 = vrot.slane %v4031_v53, 2  ;;  %6686 = vmatpush3.msra.mxu0 %v4437_v54 }
0x1bad   :  { %6688 = vmatmul.mubr.msk.f32.vlgmr.msra.gmra.mrb[58].mxu0 %vm386_vm2, %v7928_v55  ;;  %7054 = vmatprep.subr.bf16.mxu0 %v7259_v20 }
0x1bae   :  { %v4033_v58 = vmax.f32 %v4031_v53, %v4032_v57  ;;  %6690 = vmatprep.mubr.msk.f32.mxu0 %vm386_vm2, %v7933_v11  ;;  %v4549_v53 = vrot.slane %v7906_v62, %v7574_v3 }
0x1bb0   :  { %v4034_v38 = vrot.slane %v4033_v58, 1  ;;  %v4550_v57 = vmul.f32 %v4549_v53, %v7984_v15 }
0x1bb1   :  { %6691 = vmatmul.mubr.msk.f32.gmra.mrb[60].mxu0 %vm386_vm2, %v7943_v12 }
0x1bb2   :  { %v4035_v33 = vmax.f32 %v4033_v58, %v4034_v38  ;;  %6693 = vmatprep.mubr.msk.f32.mxu0 %vm386_vm2, %v7948_v39 }
0x1bb4   :  { %v4036_v1 = vsub.f32 %v4025_v36, %v4035_v33 }
0x1bb5   :  { %6694 = vmatmul.mubr.msk.f32.gmra.mrb[62].mxu0 %vm386_vm2, %v7957_v13 }
0x1bb6   :  { %v4037_v10 = vmul.f32 1.442695, %v4036_v1  ;;  %6696 = vmatprep.mubr.msk.f32.mxu0 %vm386_vm2, %v7962_v17  ;;  %v8111_v17 = vld [vmem:[%s8330_s1 + $0x8] sm:$0xff] }
0x1bb8   :  { %7230 = vpow2.f32 %v4037_v10 }
0x1bb9   :  { %6697 = vmatmul.mubr.msk.f32.gmra.mrb[64].mxu0 %vm386_vm2, %v7971_v19 }
0x1bba   :  { %6715 = vmatprep.mubr.msk.f32.mxu0 %vm7258_vm1, %v7257_v8 }
0x1bc2   :  { %v7231_v55 = vpop.eup %7230 }
0x1bc3   :  { %v4039_v11 = vsel %vm386_vm2, %v7231_v55, 0.0 }
0x1bc4   :  { %v4040_v12 = vrot.slane %v4039_v11, 4 }
0x1bc6   :  { %v4041_v39 = vadd.f32 %v4040_v12, %v4039_v11 }
0x1bc8   :  { %v4042_v45 = vrot.slane %v4041_v39, 2 }
0x1bca   :  { %v4043_v22 = vadd.f32 %v4042_v45, %v4041_v39 }
0x1bcc   :  { %v4044_v23 = vrot.slane %v4043_v22, 1 }
0x1bce   :  { %v4045_v13 = vadd.f32 %v4044_v23, %v4043_v22 }
0x1bd0   :  { %7232 = vrcp.f32 %v4045_v13 }
0x1bda   :  { %v7233_v47 = vpop.eup %7232 }
0x1bdb   :  { %v4047_v25 = vmul.f32 %v7233_v47, %v7231_v55 }
0x1bdd   :  { %v4081_v19 = vmul.f32 %v8111_v17, %v4047_v25  ;;  %v4048_v4 = vmul.f32 %v8117_v26, %v4047_v25  ;;  %v4264_v59 = vmul.f32 %v8123_v27, %v4047_v25 }
0x1bdf   :  { %4082 = vxpose.xlu0.b32.start.end [1/1] (short) (narrow) %v4081_v19, 8  ;;  %4049 = vxpose.xlu1.b32.start.end [1/1] (short) (narrow) %v4048_v4, 8 }
0x1be3   :  { %4265 = vxpose.xlu0.b32.start.end [1/1] (short) (narrow) %v4264_v59, 8 }
0x1bfd   :  { %5189 = vrot.lane.b32.xlu1 %v7914_v6, %s7260_s12 }
0x1c5f   :  { %v4098_v40 = vpop.trf.xlu0  ;;  %v4065_v21 = vpop.trf.xlu1 }
0x1c60   :  { %6668 = vmatmul.mubr.msk.f32.vlgmr.msra.gmra.mrb[38].mxu1 %vm386_vm2, %v4098_v40 }
0x1c61   :  { %6671 = vmatpush3.msra.mxu1 %v7908_v2  ;;  %6672 = vmatprep.mubr.msk.f32.mxu1 %vm7258_vm1, %v7257_v8 }
0x1c62   :  { %6675 = vmatprep.subr.mxu1 %v7257_v8 }
0x1c63   :  { %v4281_v58 = vpop.trf.xlu0 }
0x1c68   :  { %6673 = vmatmul.mubr.msk.f32.vlgmr.msra.gmra.mrb[38].mxu1 %vm386_vm2, %v4065_v21 }
0x1c69   :  { %6676 = vmatpush3.msra.mxu1 %v7912_v43  ;;  %6677 = vmatprep.mubr.msk.f32.mxu1 %vm7258_vm1, %v7257_v8 }
0x1c6a   :  { %6718 = vmatprep.subr.mxu1 %v7257_v8 }
0x1c70   :  { %6678 = vmatmul.mubr.msk.f32.vlgmr.msra.gmra.mrb[38].mxu1 %vm386_vm2, %v4281_v58 }
0x1c71   :  { %6720 = vmatprep.mubr.msk.f32.mxu1 %vm7258_vm1, %v7257_v8 }
0x1c80   :  { %v6689_v16 = vpop.f32.mrb[58].mxu0 }
0x1c81   :  { %v4507_v18 = vpop.f32.mrb[59].mxu0 }
0x1c82   :  { %v7055_v30 = vpack.c.bf16 %v6689_v16, %v4507_v18 }
0x1c84   :  { %v6692_v35 = vpop.f32.mrb[60].mxu0  ;;  %7056 = vmatpush3.bf16.msra.mxu0 %v7055_v30 }
0x1c85   :  { %v4517_v2 = vpop.f32.mrb[61].mxu0  ;;  %7057 = vmatprep.subr.bf16.mxu0 %v7259_v20 }
0x1c86   :  { %v7058_v36 = vpack.c.bf16 %v6692_v35, %v4517_v2 }
0x1c88   :  { %v6695_v50 = vpop.f32.mrb[62].mxu0  ;;  %7059 = vmatpush3.bf16.msra.mxu0 %v7058_v36 }
0x1c89   :  { %v4527_v51 = vpop.f32.mrb[63].mxu0  ;;  %7060 = vmatprep.subr.bf16.mxu0 %v7259_v20 }
0x1c8a   :  { %v7061_v43 = vpack.c.bf16 %v6695_v50, %v4527_v51 }
0x1c8c   :  { %v6698_v37 = vpop.f32.mrb[64].mxu0  ;;  %7062 = vmatpush3.bf16.msra.mxu0 %v7061_v43 }
0x1c8d   :  { %v4537_v54 = vpop.f32.mrb[65].mxu0  ;;  %7063 = vmatprep.subr.bf16.mxu0 %v7259_v20 }
0x1c8e   :  { %v7064_v56 = vpack.c.bf16 %v6698_v37, %v4537_v54 }
0x1c90   :  { %7065 = vmatpush3.bf16.msra.mxu0 %v7064_v56 }
0x1c91   :  { %6742 = vmatprep.subr.mxu0 %v7257_v8 }
0x1c93   :  { %6716 = vmatmul.mubr.msk.f32.vlgmr.msra.gmra.mrb[66].mxu0 %vm2608_vm6, %v4550_v57 }
0x1c94   :  { %6743 = vmatpush3.msra.mxu0 %v8044_v42  ;;  %6744 = vmatprep.mubr.msk.f32.mxu0 %vm7258_vm1, %v7257_v8 }
0x1c95   :  { %6747 = vmatprep.subr.mxu0 %v7257_v8 }
0x1d66   :  { %v4620_v62 = vpop.f32.mrb[66].mxu0 }
0x1d67   :  { %v4621_v38 = vadd.f32 %v4620_v62, %v8019_v34  ;;  %v6717_v33 = vpop.f32.mrb[67].mxu0  ;;  %v8167_v34 = vpop.f32.mrb[38].mxu1 }
0x1d69   :  { %v5988_v1 = vmul.f32 -1.442695, %v4621_v38 }
0x1d6b   :  { %7234 = vpow2.f32 %v5988_v1  ;;  %v5190_v1 = vpop.permute.xlu1 %5189 }
0x1d75   :  { %v7235_v10 = vpop.eup %7234 }
0x1d76   :  { %v4627_v55 = vadd.f32 1.0, %v7235_v10 }
0x1d78   :  { %7236 = vrcp.f32 %v4627_v55 }
0x1d82   :  { %v7237_v42 = vpop.eup %7236 }
0x1d83   :  { %6719 = vmatpush3.msra.mxu1 %v7237_v42 }
0x1d84   :  { %6721 = vmatmul.mubr.msk.f32.vlgmr.msra.gmra.mrb[40].mxu1 %vm386_vm2, %v8025_v52  ;;  %7066 = vmatprep.subr.bf16.mxu1 %v7259_v20 }
0x1d85   :  { %7068 = vmatpush3.bf16.msra.mxu1 %v7990_v31  ;;  %6739 = vmatprep.mubr.msk.f32.mxu1 %vm7258_vm1, %v7257_v8  ;;  %v6679_v31 = vpop.f32.mrb[39].mxu1 }
0x1d86   :  { %7069 = vmatprep.subr.bf16.mxu1 %v7259_v20 }
0x1d89   :  { %7071 = vmatpush3.bf16.msra.mxu1 %v7996_v60 }
0x1d8a   :  { %7072 = vmatprep.subr.bf16.mxu1 %v7259_v20 }
0x1d8d   :  { %7074 = vmatpush3.bf16.msra.mxu1 %v8004_v32 }
0x1d8e   :  { %7075 = vmatprep.subr.bf16.mxu1 %v7259_v20 }
0x1d91   :  { %7077 = vmatpush3.bf16.msra.mxu1 %v8010_v61 }
0x1d92   :  { %6752 = vmatprep.subr.mxu1 %v7257_v8 }
0x1e57   :  { %v4696_v52 = vpop.f32.mrb[40].mxu1 }
0x1e58   :  { %v4700_v11 = vsel %vm386_vm2, %v4696_v52, -inf  ;;  %v6722_v12 = vpop.f32.mrb[41].mxu1 }
0x1e59   :  { %v4701_v39 = vrot.slane %v4700_v11, 4  ;;  %v2930_v12 = vld [vmem:[%s8330_s1 + $0x300] sm:$0xff] }
0x1e5b   :  { %v4702_v45 = vmax.f32 %v4700_v11, %v4701_v39  ;;  %v2929_v11 = vld [vmem:[%s8330_s1 + $0x2f8] sm:$0xff]  ;;  %v2931_v39 = vld [vmem:[%s8330_s1 + $0x308] sm:$0xff] }
0x1e5d   :  { %v4703_v60 = vrot.slane %v4702_v45, 2 }
0x1e5f   :  { %v4704_v22 = vmax.f32 %v4702_v45, %v4703_v60  ;;  %v7078_v45 = vpack.c.bf16 %v2930_v12, %v2929_v11  ;;  %v2937_v11 = vld [vmem:[%s8330_s1 + $0x338] sm:$0x7] }
0x1e60   :  { %v5606_v12 = vrot.slane %v2937_v11, %v7427_v49 }
0x1e61   :  { %v4705_v23 = vrot.slane %v4704_v22, 1 }
0x1e63   :  { %v4706_v13 = vmax.f32 %v4704_v22, %v4705_v23  ;;  %v2933_v23 = vld [vmem:[%s8330_s1 + $0x318] sm:$0xff] }
0x1e65   :  { %v4707_v32 = vsub.f32 %v4696_v52, %v4706_v13  ;;  %v2934_v13 = vld [vmem:[%s8330_s1 + $0x320] sm:$0xff] }
0x1e67   :  { %v4708_v47 = vmul.f32 1.442695, %v4707_v32  ;;  %v7086_v32 = vpack.c.bf16 %v2934_v13, %v2933_v23 }
0x1e69   :  { %7238 = vpow2.f32 %v4708_v47  ;;  %v2935_v47 = vld [vmem:[%s8330_s1 + $0x328] sm:$0xff] }
0x1e73   :  { %v7239_v20 = vpop.eup %7238 }
0x1e74   :  { %v4710_v61 = vsel %vm386_vm2, %v7239_v20, 0.0 }
0x1e75   :  { %v4711_v25 = vrot.slane %v4710_v61, 4 }
0x1e77   :  { %v4712_v19 = vadd.f32 %v4711_v25, %v4710_v61 }
0x1e79   :  { %v4713_v4 = vrot.slane %v4712_v19, 2 }
0x1e7b   :  { %v4714_v59 = vadd.f32 %v4713_v4, %v4712_v19 }
0x1e7d   :  { %v4715_v40 = vrot.slane %v4714_v59, 1 }
0x1e7f   :  { %v4716_v21 = vadd.f32 %v4715_v40, %v4714_v59 }
0x1e81   :  { %7240 = vrcp.f32 %v4716_v21 }
0x1e8b   :  { %v7241_v16 = vpop.eup %7240 }
0x1e8c   :  { %v4718_v18 = vmul.f32 %v7241_v16, %v7239_v20  ;;  %v2936_v20 = vld [vmem:[%s8330_s1 + $0x330] sm:$0xff] }
0x1e8d   :  { %v7090_v61 = vpack.c.bf16 %v2936_v20, %v2935_v47  ;;  %v29_v20 = vld [vmem:[%s8330_s1 + $0x78] sm:$0xff] }
0x1e8e   :  { %v4719_v30 = vmul.f32 %v8037_v5, %v4718_v18 }
0x1e90   :  { %v4720_v35 = vsel %vm386_vm2, %v4719_v30, 0.0 }
0x1e91   :  { %4721 = vadd.xlane.f32.xlu0 %v4720_v35 }
0x1f1e   :  { %v4722_v2 = vpop.xlane.xlu0 %4721 }
0x1f1f   :  { %v4723_v36 = vmul.f32 %v4722_v2, %v7984_v15 }
0x1f21   :  { %v4724_v50 = vsel %vm2608_vm6, %v4723_v36, 0.0 }
0x1f22   :  { %v4725_v51 = vrot.slane %v4724_v50, 4 }
0x1f24   :  { %v4726_v43 = vadd.f32 %v4725_v51, %v4724_v50 }
0x1f26   :  { %v4727_v37 = vrot.slane %v4726_v43, 2 }
0x1f28   :  { %v4728_v53 = vadd.f32 %v4727_v37, %v4726_v43 }
0x1f2a   :  { %v4729_v54 = vrot.slane %v4728_v53, 1 }
0x1f2c   :  { %v4730_v56 = vadd.f32 %v4729_v54, %v4728_v53 }
0x1f2e   :  { %v4731_v57 = vmul.f32 %v4730_v56, %v7820_v28 }
0x1f30   :  { %6740 = vmatmul.mubr.msk.f32.vlgmr.msra.gmra.mrb[42].mxu1 %vm2608_vm6, %v4731_v57 }
0x1f31   :  { %6754 = vmatprep.mubr.msk.f32.mxu1 %vm7258_vm1, %v7257_v8 }
0x2003   :  { %v4801_v5 = vpop.f32.mrb[42].mxu1 }
0x2004   :  { %v6741_v58 = vpop.f32.mrb[43].mxu1  ;;  %6745 = vmatmul.mubr.msk.f32.vlgmr.msra.gmra.mrb[68].mxu0 %vm386_vm2, %v4801_v5 }
0x2005   :  { %6748 = vmatpush3.msra.mxu0 %v4718_v18  ;;  %6749 = vmatprep.mubr.msk.f32.mxu0 %vm7258_vm1, %v7257_v8  ;;  %v2921_v58 = vld [vmem:[%s8330_s1 + $0x2b8] sm:$0xff] }
0x2006   :  { %6757 = vmatprep.subr.mxu0 %v7257_v8 }
0x2008   :  { %6750 = vmatmul.mubr.msk.f32.vlgmr.msra.gmra.mrb[70].mxu0 %vm386_vm2, %v7895_v63 }
0x2009   :  { %6759 = vmatprep.mubr.msk.f32.mxu0 %vm7258_vm1, %v7257_v8 }
0x20d7   :  { %v4874_v15 = vpop.f32.mrb[68].mxu0 }
0x20d8   :  { %v6746_v62 = vpop.f32.mrb[69].mxu0 }
0x20d9   :  { %v2923_v62 = vld [vmem:[%s8330_s1 + $0x2c8] sm:$0xff] }
0x20db   :  { %v4947_v38 = vpop.f32.mrb[70].mxu0 }
0x20dc   :  { %v6751_v33 = vpop.f32.mrb[71].mxu0  ;;  %6753 = vmatpush3.xpose.msk.msra.mxu1 %vm386_vm2, %v4947_v38 }
0x20dd   :  { %6762 = vmatprep.subr.mxu1 %v7257_v8  ;;  %v2926_v33 = vld [vmem:[%s8330_s1 + $0x2e0] sm:$0xff] }
0x20df   :  { %6755 = vmatmul.mubr.msk.f32.vlgmr.msra.gmra.mrb[44].mxu1 %vm386_vm2, %v4874_v15  ;;  %v2922_v15 = vld [vmem:[%s8330_s1 + $0x2c0] sm:$0xff] }
0x20e0   :  { %6763 = vmatpush3.msra.mxu1 %v5190_v1  ;;  %6764 = vmatprep.mubr.msk.f32.mxu1 %vm7258_vm1, %v7257_v8 }
0x20e1   :  { %6767 = vmatprep.subr.mxu1 %v7257_v8 }
0x21b2   :  { %v5023_v63 = vpop.f32.mrb[44].mxu1 }
0x21b3   :  { %v5024_v10 = vadd.f32 %v5023_v63, %v8071_v0  ;;  %v6756_v55 = vpop.f32.mrb[45].mxu1  ;;  %v2932_v0 = vld [vmem:[%s8330_s1 + $0x310] sm:$0xff]  ;;  %v2927_v63 = vld [vmem:[%s8330_s1 + $0x2e8] sm:$0xff] }
0x21b4   :  { %v7082_v22 = vpack.c.bf16 %v2932_v0, %v2931_v39 }
0x21b5   :  { %v5995_v42 = vmul.f32 -1.442695, %v5024_v10  ;;  %v2928_v10 = vld [vmem:[%s8330_s1 + $0x2f0] sm:$0xff] }
0x21b6   :  { %v7106_v55 = vpack.c.bf16 %v2928_v10, %v2927_v63 }
0x21b7   :  { %7242 = vpow2.f32 %v5995_v42 }
0x21c1   :  { %v7243_v31 = vpop.eup %7242 }
0x21c2   :  { %v5030_v52 = vadd.f32 1.0, %v7243_v31 }
0x21c4   :  { %7244 = vrcp.f32 %v5030_v52 }
0x21ce   :  { %v7245_v60 = vpop.eup %7244 }
0x21cf   :  { %6758 = vmatpush3.msra.mxu0 %v7245_v60 }
0x21d0   :  { %6760 = vmatmul.mubr.msk.f32.vlgmr.msra.gmra.mrb[72].mxu0 %vm386_vm2, %v8077_v7  ;;  %7079 = vmatprep.subr.bf16.mxu0 %v7078_v45  ;;  %v5445_v7 = vmax.f32 %v8167_v34, 0.0 }
0x21d1   :  { %7081 = vmatpush3.bf16.msra.mxu0 %v7078_v45  ;;  %6793 = vmatprep.mubr.msk.f32.mxu0 %vm2608_vm6, %v7822_v29 }
0x21d2   :  { %7083 = vmatprep.subr.bf16.mxu0 %v7082_v22 }
0x21d5   :  { %7085 = vmatpush3.bf16.msra.mxu0 %v7082_v22 }
0x21d6   :  { %7087 = vmatprep.subr.bf16.mxu0 %v7086_v32 }
0x21d9   :  { %7089 = vmatpush3.bf16.msra.mxu0 %v7086_v32  ;;  %v26_v32 = vld [vmem:[%s8330_s1 + $0x60] sm:$0xff] }
0x21da   :  { %7091 = vmatprep.subr.bf16.mxu0 %v7090_v61 }
0x21dd   :  { %7093 = vmatpush3.bf16.msra.mxu0 %v7090_v61  ;;  %v30_v61 = vld [vmem:[%s8330_s1 + $0x80] sm:$0xff] }
0x21e0   :  { %6794 = vmatmul.mubr.msk.f32.vlgmr.msra.gmra.mrb[74].mxu0 %vm2608_vm6, %v7820_v28 }
0x21e1   :  { %6812 = vmatprep.mubr.msk.f32.mxu0 %vm2608_vm6, %v5445_v7  ;;  %v7150_v7 = vpack.c.bf16 %v30_v61, %v29_v20 }
0x22a3   :  { %v5099_v29 = vpop.f32.mrb[72].mxu0 }
0x22a4   :  { %v5103_v25 = vsel %vm386_vm2, %v5099_v29, -inf  ;;  %v6761_v19 = vpop.f32.mrb[73].mxu0 }
0x22a5   :  { %v5104_v4 = vrot.slane %v5103_v25, 4 }
0x22a7   :  { %v5105_v59 = vmax.f32 %v5103_v25, %v5104_v4  ;;  %v32_v25 = vld [vmem:[%s8330_s1 + $0x90] sm:$0xff] }
0x22a9   :  { %v5106_v40 = vrot.slane %v5105_v59, 2 }
0x22ab   :  { %v5107_v21 = vmax.f32 %v5105_v59, %v5106_v40 }
0x22ad   :  { %v5108_v16 = vrot.slane %v5107_v21, 1 }
0x22af   :  { %v5109_v18 = vmax.f32 %v5107_v21, %v5108_v16 }
0x22b1   :  { %v5110_v30 = vsub.f32 %v5099_v29, %v5109_v18  ;;  %v31_v29 = vld [vmem:[%s8330_s1 + $0x88] sm:$0xff] }
0x22b2   :  { %v7154_v19 = vpack.c.bf16 %v32_v25, %v31_v29 }
0x22b3   :  { %v5111_v35 = vmul.f32 1.442695, %v5110_v30 }
0x22b5   :  { %7246 = vpow2.f32 %v5111_v35 }
0x22bf   :  { %v7247_v2 = vpop.eup %7246 }
0x22c0   :  { %v5113_v34 = vsel %vm386_vm2, %v7247_v2, 0.0 }
0x22c1   :  { %v5114_v36 = vrot.slane %v5113_v34, 4 }
0x22c3   :  { %v5115_v28 = vadd.f32 %v5114_v36, %v5113_v34 }
0x22c5   :  { %v5116_v50 = vrot.slane %v5115_v28, 2 }
0x22c7   :  { %v5117_v51 = vadd.f32 %v5116_v50, %v5115_v28  ;;  %v5792_v50 = vrot.slane %v2937_v11, %v7574_v3  ;;  %v6008_v3 = vld [vmem:[%s8330_s1 + $0x98] ss:$0 sm:$0xff] }
0x22c9   :  { %v5118_v43 = vrot.slane %v5117_v51, 1 }
0x22cb   :  { %v5119_v37 = vadd.f32 %v5118_v43, %v5117_v51 }
0x22cd   :  { %7248 = vrcp.f32 %v5119_v37 }
0x22d7   :  { %v7249_v53 = vpop.eup %7248 }
0x22d8   :  { %v5121_v54 = vmul.f32 %v7249_v53, %v7247_v2 }
0x22da   :  { %v5155_v56 = vmul.f32 %v8111_v17, %v5121_v54  ;;  %v5122_v57 = vmul.f32 %v8117_v26, %v5121_v54  ;;  %v5338_v5 = vmul.f32 %v8123_v27, %v5121_v54  ;;  %v7094_v17 = vpack.c.bf16 %v2922_v15, %v2921_v58  ;;  %v2924_v26 = vld [vmem:[%s8330_s1 + $0x2d0] sm:$0xff]  ;;  %v2925_v27 = vld [vmem:[%s8330_s1 + $0x2d8] sm:$0xff] }
0x22db   :  { %v7098_v38 = vpack.c.bf16 %v2924_v26, %v2923_v62  ;;  %v7102_v1 = vpack.c.bf16 %v2926_v33, %v2925_v27  ;;  %v5798_v54 = vrot.slane %v2937_v11, %v2884_v46 }
0x22dc   :  { %5156 = vxpose.xlu0.b32.start.end [1/1] (short) (narrow) %v5155_v56, 8  ;;  %5123 = vxpose.xlu1.b32.start.end [1/1] (short) (narrow) %v5122_v57, 8 }
0x22dd   :  { %7095 = vmatprep.subr.bf16.mxu0 %v7094_v17 }
0x22de   :  { %7097 = vmatpush3.bf16.msra.mxu0 %v7094_v17 }
0x22df   :  { %7099 = vmatprep.subr.bf16.mxu0 %v7098_v38 }
0x22e0   :  { %5339 = vxpose.xlu1.b32.start.end [1/1] (short) (narrow) %v5338_v5, 8 }
0x22e2   :  { %7101 = vmatpush3.bf16.msra.mxu0 %v7098_v38 }
0x22e3   :  { %7103 = vmatprep.subr.bf16.mxu0 %v7102_v1 }
0x22e6   :  { %7105 = vmatpush3.bf16.msra.mxu0 %v7102_v1 }
0x22e7   :  { %7107 = vmatprep.subr.bf16.mxu0 %v7106_v55 }
0x22ea   :  { %7109 = vmatpush3.bf16.msra.mxu0 %v7106_v55 }
0x235c   :  { %v5172_v42 = vpop.trf.xlu0  ;;  %v5139_v31 = vpop.trf.xlu1 }
0x235d   :  { %6765 = vmatmul.mubr.msk.f32.vlgmr.msra.gmra.mrb[46].mxu1 %vm386_vm2, %v5172_v42 }
0x235e   :  { %6768 = vmatpush3.msra.mxu1 %v7914_v6  ;;  %6769 = vmatprep.mubr.msk.f32.mxu1 %vm7258_vm1, %v7257_v8 }
0x235f   :  { %6772 = vmatprep.subr.mxu1 %v7257_v8 }
0x2360   :  { %v5355_v52 = vpop.trf.xlu1 }
0x2365   :  { %6770 = vmatmul.mubr.msk.f32.vlgmr.msra.gmra.mrb[46].mxu1 %vm386_vm2, %v5139_v31 }
0x2366   :  { %6773 = vmatpush3.msra.mxu1 %v7916_v9  ;;  %6774 = vmatprep.mubr.msk.f32.mxu1 %vm7258_vm1, %v7257_v8 }
0x2367   :  { %7111 = vmatprep.subr.bf16.mxu1 %v7692_v44 }
0x236d   :  { %6775 = vmatmul.mubr.msk.f32.vlgmr.msra.gmra.mrb[46].mxu1 %vm386_vm2, %v5355_v52 }
0x236e   :  { %7113 = vmatpush3.bf16.msra.mxu1 %v7692_v44 }
0x236f   :  { %7115 = vmatprep.subr.bf16.mxu1 %v7700_v41 }
0x2372   :  { %7117 = vmatpush3.bf16.msra.mxu1 %v7700_v41 }
0x2373   :  { %7119 = vmatprep.subr.bf16.mxu1 %v7712_v14 }
0x2376   :  { %7121 = vmatpush3.bf16.msra.mxu1 %v7712_v14 }
0x2377   :  { %7123 = vmatprep.subr.bf16.mxu1 %v7729_v24 }
0x237a   :  { %7125 = vmatpush3.bf16.msra.mxu1 %v7729_v24 }
0x237b   :  { %7127 = vmatprep.subr.bf16.mxu1 %v7692_v44 }
0x2440   :  { %v5440_v8 = vpop.f32.mrb[46].mxu1 }
0x2441   :  { %v5446_v6 = vmax.f32 %v5440_v8, 0.0  ;;  %v6776_v9 = vpop.f32.mrb[47].mxu1 }
0x2443   :  { %6813 = vmatmul.mubr.msk.f32.vlgmr.msra.gmra.mrb[74].mxu0 %vm2608_vm6, %v5446_v6 }
0x2516   :  { %v6814_v39 = vpop.f32.mrb[74].mxu0 }
0x2517   :  { %v5608_v0 = vadd.f32 %v6814_v39, %v5606_v12  ;;  %v5594_v45 = vpop.f32.mrb[75].mxu0 }
0x2518   :  { %v5607_v60 = vadd.f32 %v5606_v12, %v5594_v45 }
0x2519   :  { %v5610_v23 = vmax.f32 %v5608_v0, 0.0 }
0x251a   :  { %v5609_v22 = vmax.f32 %v5607_v60, 0.0 }
0x251b   :  { %v5693_v49 = vmul.f32 %v5610_v23, %v5610_v23 }
0x251c   :  { %v5692_v13 = vmul.f32 %v5609_v22, %v5609_v22  ;;  %6831 = vmatprep.mubr.msk.f32.mxu1 %vm2608_vm6, %v5609_v22 }
0x251d   :  { %6832 = vmatmul.mubr.msk.f32.vlgmr.msra.gmra.mrb[48].mxu1 %vm2608_vm6, %v5610_v23 }
0x251e   :  { %7129 = vmatpush3.bf16.msra.mxu1 %v7692_v44  ;;  %6850 = vmatprep.mubr.msk.f32.mxu1 %vm2608_vm6, %v5692_v13  ;;  %v25_v44 = vld [vmem:[%s8330_s1 + $0x58] sm:$0xff] }
0x251f   :  { %7131 = vmatprep.subr.bf16.mxu1 %v7700_v41 }
0x2522   :  { %7133 = vmatpush3.bf16.msra.mxu1 %v7700_v41  ;;  %v7142_v41 = vpack.c.bf16 %v26_v32, %v25_v44 }
0x2523   :  { %7135 = vmatprep.subr.bf16.mxu1 %v7712_v14 }
0x2524   :  { %7143 = vmatprep.subr.bf16.mxu0 %v7142_v41 }
0x2525   :  { %7145 = vmatpush3.bf16.msra.mxu0 %v7142_v41 }
0x2526   :  { %7137 = vmatpush3.bf16.msra.mxu1 %v7712_v14  ;;  %v27_v14 = vld [vmem:[%s8330_s1 + $0x68] sm:$0xff] }
0x2527   :  { %7139 = vmatprep.subr.bf16.mxu1 %v7729_v24 }
0x252a   :  { %7141 = vmatpush3.bf16.msra.mxu1 %v7729_v24  ;;  %v28_v24 = vld [vmem:[%s8330_s1 + $0x70] sm:$0xff] }
0x252b   :  { %v7146_v47 = vpack.c.bf16 %v28_v24, %v27_v14 }
0x252d   :  { %6851 = vmatmul.mubr.msk.f32.vlgmr.msra.gmra.mrb[50].mxu1 %vm2608_vm6, %v5693_v49  ;;  %7147 = vmatprep.subr.bf16.mxu0 %v7146_v47 }
0x252e   :  { %7149 = vmatpush3.bf16.msra.mxu0 %v7146_v47 }
0x252f   :  { %7151 = vmatprep.subr.bf16.mxu0 %v7150_v7 }
0x2532   :  { %7153 = vmatpush3.bf16.msra.mxu0 %v7150_v7 }
0x2533   :  { %7155 = vmatprep.subr.bf16.mxu0 %v7154_v19 }
0x2536   :  { %7157 = vmatpush3.bf16.msra.mxu0 %v7154_v19 }
0x25f0   :  { %v6833_v4 = vpop.f32.mrb[48].mxu1 }
0x25f1   :  { %v5683_v59 = vpop.f32.mrb[49].mxu1  ;;  %v5776_v40 = vmul.f32 %v6833_v4, %v6833_v4  ;;  %v5782_v51 = vsub.f32 %v5610_v23, %v6833_v4 }
0x25f2   :  { %v5775_v21 = vmul.f32 %v5683_v59, %v5683_v59  ;;  %v5781_v37 = vsub.f32 %v5609_v22, %v5683_v59 }
0x2600   :  { %v6852_v16 = vpop.f32.mrb[50].mxu1 }
0x2601   :  { %v5778_v18 = vsub.f32 %v6852_v16, %v5776_v40  ;;  %v5766_v30 = vpop.f32.mrb[51].mxu1 }
0x2602   :  { %v5777_v35 = vsub.f32 %v5766_v30, %v5775_v21 }
0x2603   :  { %v5780_v2 = vmax.f32 %v5778_v18, 0.0 }
0x2604   :  { %v5779_v34 = vmax.f32 %v5777_v35, 0.0 }
0x2605   :  { %v5784_v36 = vadd.f32 1e-05, %v5780_v2 }
0x2606   :  { %v5783_v28 = vadd.f32 1e-05, %v5779_v34 }
0x2607   :  { %7250 = vrsqrt.f32 %v5784_v36 }
0x2608   :  { %7252 = vrsqrt.f32 %v5783_v28 }
0x2611   :  { %v7251_v43 = vpop.eup %7250 }
0x2612   :  { %v7253_v53 = vpop.eup %7252  ;;  %v5788_v56 = vmul.f32 %v7251_v43, %v5782_v51 }
0x2613   :  { %v5787_v57 = vmul.f32 %v7253_v53, %v5781_v37 }
0x2614   :  { %v5794_v5 = vmul.f32 %v5792_v50, %v5788_v56 }
0x2615   :  { %v5793_v58 = vmul.f32 %v5792_v50, %v5787_v57 }
0x2616   :  { %v5800_v15 = vadd.f32 %v5798_v54, %v5794_v5 }
0x2617   :  { %v5799_v62 = vadd.f32 %v5798_v54, %v5793_v58 }
0x2619   :  { %6869 = vmatprep.mubr.msk.f32.mxu0 %vm2608_vm6, %v5799_v62 }
0x261a   :  { %6870 = vmatmul.mubr.msk.f32.vlgmr.msra.gmra.mrb[76].mxu0 %vm2608_vm6, %v5800_v15 }
0x26ed   :  { %v6871_v17 = vpop.f32.mrb[76].mxu0 }
0x26ee   :  { %v5883_v26 = vadd.f32 %v6871_v17, %v6008_v3  ;;  %v5877_v38 = vpop.f32.mrb[77].mxu0 }
0x26ef   :  { %v5878_v27 = vadd.f32 %v6008_v3, %v5877_v38 }
0x26f0   :  { %5887 = vst.msk [vmem:[%s8333_s3 + $0x8] sm:$0xff] %vm460_vm3, %v5883_v26 }
0x26f1   :  { %5886 = vst.msk [vmem:[%s8333_s3] sm:$0xff] %vm460_vm3, %v5878_v27 }

</bundles_post_ra>
